<compile_context>
chip_gen: v7x
topology: tpu7x:2x2x1
jax: 0.10.0
libtpu: 0.0.40
codegen_flags: <defaults>
</compile_context>

<pallas_src>
import functools

import jax
import jax.numpy as jnp
from jax.experimental import pallas as pl
from jax.experimental.pallas import tpu as pltpu

_LANES = 128


# -----------------------------------------------------------------------------
# Segmented (width = C_pad lanes) all-reduce for max / first-argmax (XLU path).
# -----------------------------------------------------------------------------
def _seg_allreduce(x, seg, op, masks):
    """Every lane of each aligned `seg`-wide lane segment ends up holding the
    op-reduction over that segment (XOR butterfly built from pltpu.roll)."""
    n = x.shape[-1]
    s, k = 1, 0
    while s < seg:
        fwd = pltpu.roll(x, s, axis=1)
        bwd = pltpu.roll(x, n - s, axis=1)
        x = op(x, jnp.where(masks[k], fwd, bwd))
        s *= 2
        k += 1
    return x


# -----------------------------------------------------------------------------
# Packed kernel: 128/C_pad samples per lane row, per-core partial stats output.
#   out block rows: 0 = tp, 1 = pred-count (col), 2 = gt-count (row),
#                   3 = sum gt*log_softmax (unweighted CCE partial), 4..7 unused.
# -----------------------------------------------------------------------------
def _packed_stats_kernel(pred_ref, gt_ref, seg_ref, out_ref, *,
                         c_pad, rows_valid, block_rows, steps_per_core,
                         gt_is_one_hot):
    ci = pl.program_id(0)
    ii = pl.program_id(1)
    g = ci * steps_per_core + ii          # global block index (may be past the end)

    @pl.when(ii == 0)
    def _init():
        out_ref[...] = jnp.zeros_like(out_ref)

    pred = pred_ref[...].astype(jnp.float32)      # (BR, 128) packed logits
    gt = gt_ref[...].astype(jnp.float32)          # (BR, 128) packed targets
    seg_mat = seg_ref[...]                        # (128, 128) bf16 block-diag ones

    # Lane-invariant constants at (1, 128) only; broadcasting handles the rest.
    lane = jax.lax.broadcasted_iota(jnp.int32, (1, _LANES), 1)
    lane_f = lane.astype(jnp.float32)
    lane_in_seg = (lane & (c_pad - 1)).astype(jnp.float32)
    masks = []           # butterfly partner-direction masks (roll-convention free)
    s = 1
    while s < c_pad:
        masks.append(pltpu.roll(lane_f, s, axis=1) == (lane ^ s).astype(jnp.float32))
        s *= 2

    def accumulate(pred_t, gt_t, lhs):
        # Segmented log-softmax (== softmax(dim=1) of the original (N, C) layout).
        m_p = _seg_allreduce(pred_t, c_pad, jnp.maximum, masks)
        e = jnp.exp(pred_t - m_p)
        # Segmented sum-of-exp on the otherwise-idle MXU; hi/lo bf16 split keeps
        # ~f32 accuracy while using only native bf16 matmuls.
        e_hi = e.astype(jnp.bfloat16)
        e_lo = (e - e_hi.astype(jnp.float32)).astype(jnp.bfloat16)
        z = (jnp.dot(e_hi, seg_mat, preferred_element_type=jnp.float32)
             + jnp.dot(e_lo, seg_mat, preferred_element_type=jnp.float32))
        lsm = pred_t - m_p - jnp.log(z)

        # argmax one-hots, first-max tie break (matches torch/jnp argmax).
        big = jnp.float32(c_pad)
        p_first = _seg_allreduce(jnp.where(pred_t == m_p, lane_in_seg, big),
                                 c_pad, jnp.minimum, masks)
        pred_oh = (lane_in_seg == p_first).astype(jnp.bfloat16)
        if gt_is_one_hot:
            gt_oh = gt_t.astype(jnp.bfloat16)     # fast path: gt already one-hot
        else:
            m_g = _seg_allreduce(gt_t, c_pad, jnp.maximum, masks)
            g_first = _seg_allreduce(jnp.where(gt_t == m_g, lane_in_seg, big),
                                     c_pad, jnp.minimum, masks)
            gt_oh = (lane_in_seg == g_first).astype(jnp.bfloat16)

        # Sample reductions on the MXU: (1,BR)@(BR,128); 0/1 one-hots are exact in
        # bf16 so the confusion counts stay exact.  The CCE partial stays in f32 on
        # the VPU (no bf16 rounding of gt*lsm); class weights applied in epilogue.
        tp = jnp.dot(lhs, gt_oh * pred_oh, preferred_element_type=jnp.float32)
        col = jnp.dot(lhs, pred_oh, preferred_element_type=jnp.float32)
        row = jnp.dot(lhs, gt_oh, preferred_element_type=jnp.float32)
        cce = jnp.sum(gt_t * lsm, axis=0, keepdims=True)
        out_ref[0:1, :] += tp
        out_ref[1:2, :] += col
        out_ref[2:3, :] += row
        out_ref[3:4, :] += cce

    # Only blocks touching (or past) the end of the packed array pay for masking.
    needs_mask = (g + 1) * block_rows > rows_valid

    @pl.when(jnp.logical_not(needs_mask))
    def _full_block():
        accumulate(pred, gt, jnp.ones((1, block_rows), jnp.bfloat16))

    @pl.when(needs_mask)
    def _edge_block():
        row_col = jax.lax.broadcasted_iota(jnp.int32, (block_rows, 1), 0)
        valid_col = (g * block_rows + row_col) < rows_valid
        row_lane = jax.lax.broadcasted_iota(jnp.int32, (1, block_rows), 1)
        lhs = ((g * block_rows + row_lane) < rows_valid).astype(jnp.bfloat16)
        # Sanitize rows past the end (undefined contents) so exp/log stay finite;
        # the zeroed gt and the masked matmul LHS drop their contribution.
        accumulate(jnp.where(valid_col, pred, 0.0),
                   jnp.where(valid_col, gt, 0.0), lhs)


# -----------------------------------------------------------------------------
# Fallback kernel for C > 128: class axis directly on lanes.  Rare path; kept
# simple (per-step masking, scalar result in-kernel).
# TODO(synk): the C > 128 fallback does not use the megacore split / mask gating.
# -----------------------------------------------------------------------------
def _tiled_loss_kernel(pred_ref, gt_ref, w_ref, out_ref,
                       tp_acc, col_acc, row_acc, cce_acc, *,
                       n_true, block_rows, gt_is_one_hot, cce_weight,
                       dice_weight, tversky_alpha, focal_gamma):
    pid = pl.program_id(0)

    @pl.when(pid == 0)
    def _init():
        tp_acc[...] = jnp.zeros_like(tp_acc)
        col_acc[...] = jnp.zeros_like(col_acc)
        row_acc[...] = jnp.zeros_like(row_acc)
        cce_acc[...] = jnp.zeros_like(cce_acc)

    pred = pred_ref[...].astype(jnp.float32)       # (block_rows, C)
    gt = gt_ref[...].astype(jnp.float32)
    w = w_ref[...].astype(jnp.float32)             # (1, C)
    tn, c = pred.shape

    row_ids = jax.lax.broadcasted_iota(jnp.int32, (tn, c), 0)
    col_ids = jax.lax.broadcasted_iota(jnp.int32, (tn, c), 1)
    valid = (pid * block_rows + row_ids) < n_true

    row_max = jnp.max(pred, axis=1, keepdims=True)
    shifted = pred - row_max
    lse = jnp.log(jnp.sum(jnp.exp(shifted), axis=1, keepdims=True))
    lsm = shifted - lse

    pred_idx = jnp.min(jnp.where(pred == row_max, col_ids, c),
                       axis=1, keepdims=True)
    pred_oh = (col_ids == pred_idx).astype(jnp.float32)
    if gt_is_one_hot:
        gt_oh = gt
    else:
        gt_max = jnp.max(gt, axis=1, keepdims=True)
        gt_idx = jnp.min(jnp.where(gt == gt_max, col_ids, c),
                         axis=1, keepdims=True)
        gt_oh = (col_ids == gt_idx).astype(jnp.float32)

    zero = jnp.float32(0.0)
    tp_acc[...] += jnp.sum(jnp.where(valid, gt_oh * pred_oh, zero),
                           axis=0, keepdims=True)
    col_acc[...] += jnp.sum(jnp.where(valid, pred_oh, zero),
                            axis=0, keepdims=True)
    row_acc[...] += jnp.sum(jnp.where(valid, gt_oh, zero),
                            axis=0, keepdims=True)
    cce_acc[...] += jnp.sum(jnp.where(valid, w * gt * lsm, zero),
                            axis=0, keepdims=True)

    @pl.when(pid == pl.num_programs(0) - 1)
    def _finalize():
        tp = tp_acc[...]
        fp = col_acc[...] - tp
        fn = row_acc[...] - tp
        beta = 1.0 - tversky_alpha
        eps = 1e-8
        tversky = (tp + eps) / (tp + fp * beta + fn * tversky_alpha + eps)
        focal = jnp.power(1.0 - tversky, focal_gamma)
        wft = jnp.sum(focal * w) / jnp.sum(row_acc[...] * w)
        wcce = -jnp.sum(cce_acc[...]) / jnp.float32(n_true)
        out_ref[0, 0] = wcce * cce_weight + wft * dice_weight


# -----------------------------------------------------------------------------
# Wrapper
# -----------------------------------------------------------------------------
def _pick_block_rows(total_rows, requested):
    if total_rows <= requested:
        return total_rows                   # full-extent block (always legal)
    return max(8, (requested // 8) * 8)     # multiple of 8 for the (8,128) rule


def weighted_cce_focal_tversky_loss(predictions, ground_truth, class_weights,
                                    cce_weight=0.1, dice_weight=1.0,
                                    tversky_alpha=0.7, focal_gamma=0.75,
                                    ground_truth_is_one_hot=False,
                                    tile_rows=1024, num_cores=2):
    """predictions / ground_truth: (N, C), class axis last.  class_weights: (C,)."""
    assert predictions.ndim == 2 and predictions.shape == ground_truth.shape
    n, c = predictions.shape
    w = jnp.asarray(class_weights, jnp.float32).reshape(c)
    cparams_seq = pltpu.CompilerParams(dimension_semantics=("arbitrary",),
                                       vmem_limit_bytes=32 * 1024 * 1024)

    # ---------------- C > 128: class-on-lanes fallback ----------------
    if c > _LANES:
        br = _pick_block_rows(n, tile_rows)
        kernel = functools.partial(
            _tiled_loss_kernel, n_true=n, block_rows=br,
            gt_is_one_hot=bool(ground_truth_is_one_hot),
            cce_weight=float(cce_weight), dice_weight=float(dice_weight),
            tversky_alpha=float(tversky_alpha), focal_gamma=float(focal_gamma))
        out = pl.pallas_call(
            kernel,
            out_shape=jax.ShapeDtypeStruct((1, 1), jnp.float32),
            grid_spec=pltpu.PrefetchScalarGridSpec(
                num_scalar_prefetch=0,
                grid=(pl.cdiv(n, br),),
                in_specs=[pl.BlockSpec((br, c), lambda i: (i, 0)),
                          pl.BlockSpec((br, c), lambda i: (i, 0)),
                          pl.BlockSpec((1, c), lambda i: (0, 0))],
                out_specs=pl.BlockSpec((1, 1), lambda i: (0, 0)),
                scratch_shapes=[pltpu.VMEM((1, c), jnp.float32)] * 4),
            compiler_params=cparams_seq,
        )(predictions, ground_truth, w.reshape(1, c))
        return out[0, 0]

    # ---------------- C <= 128: packed path ----------------
    c_pad = 1 << max(c - 1, 0).bit_length()     # next power of two >= c
    spr = _LANES // c_pad                       # samples per packed lane row
    n_main = (n // spr) * spr
    n_tail = n - n_main

    if n_main > 0:
        # Zero-copy when N % spr == 0 and C is already a power of two; otherwise
        # only the prefix / class padding is copied and the tiny tail is handled
        # exactly in the epilogue (no full-array jnp.pad).
        pred_main = predictions if n_tail == 0 else predictions[:n_main]
        gt_main = ground_truth if n_tail == 0 else ground_truth[:n_main]
        if c_pad != c:
            pad = ((0, 0), (0, c_pad - c))
            pred_main = jnp.pad(pred_main, pad, constant_values=-1e30)
            gt_main = jnp.pad(gt_main, pad)
        r = n_main // spr
        pred_pk = pred_main.reshape(r, _LANES)       # free row-major view
        gt_pk = gt_main.reshape(r, _LANES)

        seg_ids = jnp.arange(_LANES, dtype=jnp.int32) // c_pad
        seg_mat = (seg_ids[:, None] == seg_ids[None, :]).astype(jnp.bfloat16)

        br = _pick_block_rows(r, tile_rows)
        steps_total = pl.cdiv(r, br)
        cores = max(1, min(int(num_cores), steps_total))
        spc = pl.cdiv(steps_total, cores)

        def data_map(ci, ii):
            g = ci * spc + ii
            return (jnp.minimum(g, steps_total - 1), 0)   # clamp over-hanging blocks

        kernel = functools.partial(
            _packed_stats_kernel, c_pad=c_pad, rows_valid=r, block_rows=br,
            steps_per_core=spc, gt_is_one_hot=bool(ground_truth_is_one_hot))
        out = pl.pallas_call(
            kernel,
            out_shape=jax.ShapeDtypeStruct((cores * 8, _LANES), jnp.float32),
            grid_spec=pltpu.PrefetchScalarGridSpec(
                num_scalar_prefetch=0,
                grid=(cores, spc),
                in_specs=[pl.BlockSpec((br, _LANES), data_map),
                          pl.BlockSpec((br, _LANES), data_map),
                          pl.BlockSpec((_LANES, _LANES), lambda ci, ii: (0, 0))],
                out_specs=pl.BlockSpec((8, _LANES), lambda ci, ii: (ci, 0))),
            compiler_params=pltpu.CompilerParams(
                dimension_semantics=("parallel", "arbitrary"),
                vmem_limit_bytes=32 * 1024 * 1024),
        )(pred_pk, gt_pk, seg_mat)

        stats = out.reshape(cores, 8, _LANES).sum(axis=0)              # (8, 128)
        per_class = stats[0:4].reshape(4, spr, c_pad).sum(axis=1)[:, :c]
        tp, col, row_cnt, cce_sum = (per_class[0], per_class[1],
                                     per_class[2], per_class[3])
    else:
        tp = col = row_cnt = cce_sum = jnp.zeros((c,), jnp.float32)

    if n_tail > 0:
        # <= spr-1 samples: exact plain-JAX contribution (avoids an O(N) pad).
        pred_t = predictions[n_main:].astype(jnp.float32)
        gt_t = ground_truth[n_main:].astype(jnp.float32)
        lsm_t = jax.nn.log_softmax(pred_t, axis=1)
        p_oh = jax.nn.one_hot(jnp.argmax(pred_t, axis=1), c, dtype=jnp.float32)
        if ground_truth_is_one_hot:
            g_oh = gt_t
        else:
            g_oh = jax.nn.one_hot(jnp.argmax(gt_t, axis=1), c, dtype=jnp.float32)
        tp = tp + jnp.sum(p_oh * g_oh, axis=0)
        col = col + jnp.sum(p_oh, axis=0)
        row_cnt = row_cnt + jnp.sum(g_oh, axis=0)
        cce_sum = cce_sum + jnp.sum(gt_t * lsm_t, axis=0)

    # O(C) finalisation: Tversky / focal pow / CCE blend.
    # TODO(synk): only the module default reduction='mean' is implemented.
    eps = 1e-8
    beta = 1.0 - tversky_alpha
    fp = col - tp
    fn = row_cnt - tp
    tversky = (tp + eps) / (tp + fp * beta + fn * tversky_alpha + eps)
    focal = jnp.power(1.0 - tversky, focal_gamma)
    wft = jnp.sum(focal * w) / jnp.sum(row_cnt * w)
    wcce = -jnp.sum(cce_sum * w) / jnp.float32(n)
    return wcce * cce_weight + wft * dice_weight


# -----------------------------------------------------------------------------
# Pure-JAX reference (mirror of the PyTorch forward) for correctness checking.
# -----------------------------------------------------------------------------
def _reference_loss(predictions, ground_truth, class_weights,
                    cce_weight=0.1, dice_weight=1.0,
                    tversky_alpha=0.7, focal_gamma=0.75):
    beta = 1.0 - tversky_alpha
    n, c = predictions.shape
    lsm = jax.nn.log_softmax(predictions, axis=1)
    pred_cat = jnp.argmax(predictions, axis=1)
    gt_cat = jnp.argmax(ground_truth, axis=1)
    cm = jnp.zeros((c, c), jnp.float32).at[gt_cat, pred_cat].add(1.0)
    tp = jnp.diag(cm)
    fp = cm.sum(axis=0) - tp
    fn = cm.sum(axis=1) - tp
    eps = 1e-8
    tversky = (tp + eps) / (tp + fp * beta + fn * tversky_alpha + eps)
    ft = jnp.power(1.0 - tversky, focal_gamma)
    wft = jnp.sum(ft * class_weights) / jnp.sum(class_weights[gt_cat])
    cce = jnp.mean(-jnp.sum(class_weights[None, :] * ground_truth * lsm, axis=1))
    return cce * cce_weight + wft * dice_weight


if __name__ == "__main__":
    def _check(pred, gt, wts, one_hot, tile_rows):
        got = weighted_cce_focal_tversky_loss(
            pred, gt, wts, ground_truth_is_one_hot=one_hot, tile_rows=tile_rows)
        want = _reference_loss(pred.astype(jnp.float32),
                               gt.astype(jnp.float32), wts)
        got, want = jax.block_until_ready((got, want))
        assert jnp.allclose(got, want, rtol=5e-4, atol=5e-4), (got, want)

    key = jax.random.PRNGKey(0)
    k1, k2, k3, k4, k5, k6 = jax.random.split(key, 6)
    w4 = jnp.array([1.0, 2.0, 0.5, 1.5], dtype=jnp.float32)
    w6 = jnp.array([1.0, 0.5, 2.0, 1.5, 0.75, 1.25], dtype=jnp.float32)

    # 1) packed path, C=4, one-hot labels, 2 cores (1 full + 1 partial block) + tail.
    n, c = 293, 4
    pred = jax.random.normal(k1, (n, c), dtype=jnp.float32)
    gt = jax.nn.one_hot(jax.random.randint(k2, (n,), 0, c), c, dtype=jnp.float32)
    _check(pred, gt, w4, True, 8)

    # 2) packed path, soft labels, exact divisibility, even 2-core split.
    n, c = 512, 4
    pred2 = jax.random.normal(k3, (n, c), dtype=jnp.float32)
    gt2 = jax.nn.softmax(jax.random.normal(k4, (n, c), dtype=jnp.float32), axis=1)
    _check(pred2, gt2, w4, False, 8)

    # 3) packed path via class padding (C=6 -> 8), one-hot labels, tail samples.
    n, c = 67, 6
    pred = jax.random.normal(k5, (n, c), dtype=jnp.float32)
    gt = jax.nn.one_hot(jnp.arange(n) % c, c, dtype=jnp.float32)
    _check(pred, gt, w6, True, 1024)

    # 4) C > 128 fallback kernel.
    n, c = 20, 130
    pred = jax.random.normal(k6, (n, c), dtype=jnp.float32)
    gt = jax.nn.one_hot(jnp.arange(n) % c, c, dtype=jnp.float32)
    w130 = jnp.linspace(0.5, 2.0, c, dtype=jnp.float32)
    _check(pred, gt, w130, True, 16)

    # 5) bf16 inputs on the packed path (kernel casts in-kernel; v5e-friendly).
    _check(pred2.astype(jnp.bfloat16), gt2.astype(jnp.bfloat16), w4, False, 8)

    print("KERNEL_OK")
</pallas_src>

<mosaic_0001>
module attributes {stable_mosaic.version = 11 : i64} {
  func.func @_packed_stats_kernel(%arg0: i32, %arg1: i32, %arg2: memref<8x128xf32, #tpu.memory_space<vmem>>, %arg3: memref<8x128xf32, #tpu.memory_space<vmem>>, %arg4: memref<128x128xbf16, #tpu.memory_space<vmem>>, %arg5: memref<8x128xf32, #tpu.memory_space<vmem>>) attributes {dimension_semantics = [#tpu.dimension_semantics<parallel>, #tpu.dimension_semantics<arbitrary>], iteration_bounds = array<i64: 2, 1>, scalar_prefetch = 0 : i64, scratch_operands = 0 : i64, tpu.core_type = #tpu.core_type<tc>, window_params = [{transform_indices = @transform_0, window_bounds = array<i64: 8, 128>}, {transform_indices = @transform_1, window_bounds = array<i64: 8, 128>}, {pipeline_mode = #tpu.pipeline_mode<synchronous>, transform_indices = @transform_2, window_bounds = array<i64: 128, 128>}, {transform_indices = @transform_3, window_bounds = array<i64: 8, 128>}]} {
    %c1_i32 = arith.constant 1 : i32
    %0 = arith.muli %arg0, %c1_i32 : i32
    %1 = arith.addi %0, %arg1 : i32
    %c0_i32 = arith.constant 0 : i32
    %2 = arith.cmpi eq, %arg1, %c0_i32 : i32
    %3 = arith.extui %2 : i1 to i32
    %c0_i32_0 = arith.constant 0 : i32
    %4 = arith.cmpi ne, %3, %c0_i32_0 : i32
    scf.if %4 {
      %cst = arith.constant 0.000000e+00 : f32
      %31 = vector.broadcast %cst : f32 to vector<8x128xf32>
      %c0_12 = arith.constant 0 : index
      %c0_13 = arith.constant 0 : index
      %32 = vector.load %arg5[%c0_12, %c0_13] : memref<8x128xf32, #tpu.memory_space<vmem>>, vector<8x128xf32>
      tpu.vector_store %arg5[%c0_12, %c0_13], %31 {strides = array<i32>} : memref<8x128xf32, #tpu.memory_space<vmem>>, vector<8x128xf32>,
    } else {
    }
    %c0 = arith.constant 0 : index
    %c0_1 = arith.constant 0 : index
    %5 = vector.load %arg2[%c0, %c0_1] : memref<8x128xf32, #tpu.memory_space<vmem>>, vector<8x128xf32>
    %c0_2 = arith.constant 0 : index
    %c0_3 = arith.constant 0 : index
    %6 = vector.load %arg3[%c0_2, %c0_3] : memref<8x128xf32, #tpu.memory_space<vmem>>, vector<8x128xf32>
    %c0_4 = arith.constant 0 : index
    %c0_5 = arith.constant 0 : index
    %7 = vector.load %arg4[%c0_4, %c0_5] : memref<128x128xbf16, #tpu.memory_space<vmem>>, vector<128x128xbf16>
    %8 = tpu.iota {dimensions = array<i32: 1>} : vector<1x128xi32>
    %9 = arith.sitofp %8 : vector<1x128xi32> to vector<1x128xf32>
    %c3_i32 = arith.constant 3 : i32
    %10 = vector.broadcast %c3_i32 : i32 to vector<1x128xi32>
    %11 = arith.andi %8, %10 : vector<1x128xi32>
    %12 = arith.sitofp %11 : vector<1x128xi32> to vector<1x128xf32>
    %c1_i32_6 = arith.constant 1 : i32
    %13 = tpu.dynamic_rotate %9 by %c1_i32_6 dim 1 : vector<1x128xf32>, i32 -> vector<1x128xf32>
    %c1_i32_7 = arith.constant 1 : i32
    %14 = vector.broadcast %c1_i32_7 : i32 to vector<1x128xi32>
    %15 = arith.xori %8, %14 : vector<1x128xi32>
    %16 = arith.sitofp %15 : vector<1x128xi32> to vector<1x128xf32>
    %17 = arith.cmpf oeq, %13, %16 : vector<1x128xf32>
    %c2_i32 = arith.constant 2 : i32
    %18 = tpu.dynamic_rotate %9 by %c2_i32 dim 1 : vector<1x128xf32>, i32 -> vector<1x128xf32>
    %c2_i32_8 = arith.constant 2 : i32
    %19 = vector.broadcast %c2_i32_8 : i32 to vector<1x128xi32>
    %20 = arith.xori %8, %19 : vector<1x128xi32>
    %21 = arith.sitofp %20 : vector<1x128xi32> to vector<1x128xf32>
    %22 = arith.cmpf oeq, %18, %21 : vector<1x128xf32>
    %c1_i32_9 = arith.constant 1 : i32
    %23 = arith.addi %1, %c1_i32_9 : i32
    %c8_i32 = arith.constant 8 : i32
    %24 = arith.muli %23, %c8_i32 : i32
    %c9_i32 = arith.constant 9 : i32
    %25 = arith.cmpi sgt, %24, %c9_i32 : i32
    %true = arith.constant true
    %26 = arith.xori %25, %true : i1
    %27 = arith.extui %26 : i1 to i32
    %c0_i32_10 = arith.constant 0 : i32
    %28 = arith.cmpi ne, %27, %c0_i32_10 : i32
    scf.if %28 {
      %cst = arith.constant 1.000000e+00 : bf16
      %31 = vector.broadcast %cst : bf16 to vector<1x8xbf16>
      %c1_i32_12 = arith.constant 1 : i32
      %32 = tpu.dynamic_rotate %5 by %c1_i32_12 dim 1 : vector<8x128xf32>, i32 -> vector<8x128xf32>
      %c127_i32 = arith.constant 127 : i32
      %33 = tpu.dynamic_rotate %5 by %c127_i32 dim 1 : vector<8x128xf32>, i32 -> vector<8x128xf32>
      %34 = vector.shape_cast %17 : vector<1x128xi1> to vector<1x128xi1>
      %35 = vector.broadcast %34 : vector<1x128xi1> to vector<8x128xi1>
      %36 = arith.select %35, %32, %33 : vector<8x128xi1>, vector<8x128xf32>
      %37 = arith.maximumf %5, %36 : vector<8x128xf32>
      %c2_i32_13 = arith.constant 2 : i32
      %38 = tpu.dynamic_rotate %37 by %c2_i32_13 dim 1 : vector<8x128xf32>, i32 -> vector<8x128xf32>
      %c126_i32 = arith.constant 126 : i32
      %39 = tpu.dynamic_rotate %37 by %c126_i32 dim 1 : vector<8x128xf32>, i32 -> vector<8x128xf32>
      %40 = vector.shape_cast %22 : vector<1x128xi1> to vector<1x128xi1>
      %41 = vector.broadcast %40 : vector<1x128xi1> to vector<8x128xi1>
      %42 = arith.select %41, %38, %39 : vector<8x128xi1>, vector<8x128xf32>
      %43 = arith.maximumf %37, %42 : vector<8x128xf32>
      %44 = arith.subf %5, %43 : vector<8x128xf32>
      %45 = math.exp %44 : vector<8x128xf32>
      %46 = arith.truncf %45 : vector<8x128xf32> to vector<8x128xbf16>
      %47 = arith.extf %46 : vector<8x128xbf16> to vector<8x128xf32>
      %48 = arith.subf %45, %47 : vector<8x128xf32>
      %49 = arith.truncf %48 : vector<8x128xf32> to vector<8x128xbf16>
      %cst_14 = arith.constant dense<0.000000e+00> : vector<8x128xf32>
      %50 = tpu.matmul %46, %7, %cst_14 {dimension_numbers = #tpu.dot_dimension_numbers<[1], [0], [0], [1], [0, 0, 1, 1], [], []>} : vector<8x128xbf16>, vector<128x128xbf16>, vector<8x128xf32> -> vector<8x128xf32>
      %cst_15 = arith.constant dense<0.000000e+00> : vector<8x128xf32>
      %51 = tpu.matmul %49, %7, %cst_15 {dimension_numbers = #tpu.dot_dimension_numbers<[1], [0], [0], [1], [0, 0, 1, 1], [], []>} : vector<8x128xbf16>, vector<128x128xbf16>, vector<8x128xf32> -> vector<8x128xf32>
      %52 = arith.addf %50, %51 : vector<8x128xf32>
      %53 = arith.subf %5, %43 : vector<8x128xf32>
      %54 = math.log %52 : vector<8x128xf32>
      %55 = arith.subf %53, %54 : vector<8x128xf32>
      %56 = arith.cmpf oeq, %5, %43 : vector<8x128xf32>
      %cst_16 = arith.constant 4.000000e+00 : f32
      %57 = vector.shape_cast %12 : vector<1x128xf32> to vector<1x128xf32>
      %58 = vector.broadcast %57 : vector<1x128xf32> to vector<8x128xf32>
      %59 = vector.broadcast %cst_16 : f32 to vector<8x128xf32>
      %60 = arith.select %56, %58, %59 : vector<8x128xi1>, vector<8x128xf32>
      %c1_i32_17 = arith.constant 1 : i32
      %61 = tpu.dynamic_rotate %60 by %c1_i32_17 dim 1 : vector<8x128xf32>, i32 -> vector<8x128xf32>
      %c127_i32_18 = arith.constant 127 : i32
      %62 = tpu.dynamic_rotate %60 by %c127_i32_18 dim 1 : vector<8x128xf32>, i32 -> vector<8x128xf32>
      %63 = vector.shape_cast %17 : vector<1x128xi1> to vector<1x128xi1>
      %64 = vector.broadcast %63 : vector<1x128xi1> to vector<8x128xi1>
      %65 = arith.select %64, %61, %62 : vector<8x128xi1>, vector<8x128xf32>
      %66 = arith.minimumf %60, %65 : vector<8x128xf32>
      %c2_i32_19 = arith.constant 2 : i32
      %67 = tpu.dynamic_rotate %66 by %c2_i32_19 dim 1 : vector<8x128xf32>, i32 -> vector<8x128xf32>
      %c126_i32_20 = arith.constant 126 : i32
      %68 = tpu.dynamic_rotate %66 by %c126_i32_20 dim 1 : vector<8x128xf32>, i32 -> vector<8x128xf32>
      %69 = vector.shape_cast %22 : vector<1x128xi1> to vector<1x128xi1>
      %70 = vector.broadcast %69 : vector<1x128xi1> to vector<8x128xi1>
      %71 = arith.select %70, %67, %68 : vector<8x128xi1>, vector<8x128xf32>
      %72 = arith.minimumf %66, %71 : vector<8x128xf32>
      %73 = vector.broadcast %12 : vector<1x128xf32> to vector<8x128xf32>
      %74 = arith.cmpf oeq, %73, %72 : vector<8x128xf32>
      %75 = arith.extui %74 : vector<8x128xi1> to vector<8x128xi32>
      %76 = arith.sitofp %75 : vector<8x128xi32> to vector<8x128xf32>
      %77 = arith.truncf %76 : vector<8x128xf32> to vector<8x128xbf16>
      %78 = arith.truncf %6 : vector<8x128xf32> to vector<8x128xbf16>
      %79 = arith.mulf %78, %77 : vector<8x128xbf16>
      %cst_21 = arith.constant dense<0.000000e+00> : vector<1x128xf32>
      %80 = tpu.matmul %31, %79, %cst_21 {dimension_numbers = #tpu.dot_dimension_numbers<[1], [0], [0], [1], [0, 0, 1, 1], [], []>} : vector<1x8xbf16>, vector<8x128xbf16>, vector<1x128xf32> -> vector<1x128xf32>
      %cst_22 = arith.constant dense<0.000000e+00> : vector<1x128xf32>
      %81 = tpu.matmul %31, %77, %cst_22 {dimension_numbers = #tpu.dot_dimension_numbers<[1], [0], [0], [1], [0, 0, 1, 1], [], []>} : vector<1x8xbf16>, vector<8x128xbf16>, vector<1x128xf32> -> vector<1x128xf32>
      %cst_23 = arith.constant dense<0.000000e+00> : vector<1x128xf32>
      %82 = tpu.matmul %31, %78, %cst_23 {dimension_numbers = #tpu.dot_dimension_numbers<[1], [0], [0], [1], [0, 0, 1, 1], [], []>} : vector<1x8xbf16>, vector<8x128xbf16>, vector<1x128xf32> -> vector<1x128xf32>
      %83 = arith.mulf %6, %55 : vector<8x128xf32>
      %cst_24 = arith.constant dense<0.000000e+00> : vector<128xf32>
      %84 = vector.multi_reduction <add>, %83, %cst_24 [0] : vector<8x128xf32> to vector<128xf32>
      %85 = vector.shape_cast %84 : vector<128xf32> to vector<1x128xf32>
      %c0_25 = arith.constant 0 : index
      %c0_26 = arith.constant 0 : index
      %86 = vector.load %arg5[%c0_25, %c0_26] : memref<8x128xf32, #tpu.memory_space<vmem>>, vector<1x128xf32>
      %87 = arith.addf %86, %80 : vector<1x128xf32>
      %c0_27 = arith.constant 0 : index
      %c0_28 = arith.constant 0 : index
      %88 = vector.load %arg5[%c0_27, %c0_28] : memref<8x128xf32, #tpu.memory_space<vmem>>, vector<1x128xf32>
      tpu.vector_store %arg5[%c0_27, %c0_28], %87 {strides = array<i32>} : memref<8x128xf32, #tpu.memory_space<vmem>>, vector<1x128xf32>,
      %c1 = arith.constant 1 : index
      %c0_29 = arith.constant 0 : index
      %89 = vector.load %arg5[%c1, %c0_29] : memref<8x128xf32, #tpu.memory_space<vmem>>, vector<1x128xf32>
      %90 = arith.addf %89, %81 : vector<1x128xf32>
      %c1_30 = arith.constant 1 : index
      %c0_31 = arith.constant 0 : index
      %91 = vector.load %arg5[%c1_30, %c0_31] : memref<8x128xf32, #tpu.memory_space<vmem>>, vector<1x128xf32>
      tpu.vector_store %arg5[%c1_30, %c0_31], %90 {strides = array<i32>} : memref<8x128xf32, #tpu.memory_space<vmem>>, vector<1x128xf32>,
      %c2 = arith.constant 2 : index
      %c0_32 = arith.constant 0 : index
      %92 = vector.load %arg5[%c2, %c0_32] : memref<8x128xf32, #tpu.memory_space<vmem>>, vector<1x128xf32>
      %93 = arith.addf %92, %82 : vector<1x128xf32>
      %c2_33 = arith.constant 2 : index
      %c0_34 = arith.constant 0 : index
      %94 = vector.load %arg5[%c2_33, %c0_34] : memref<8x128xf32, #tpu.memory_space<vmem>>, vector<1x128xf32>
      tpu.vector_store %arg5[%c2_33, %c0_34], %93 {strides = array<i32>} : memref<8x128xf32, #tpu.memory_space<vmem>>, vector<1x128xf32>,
      %c3 = arith.constant 3 : index
      %c0_35 = arith.constant 0 : index
      %95 = vector.load %arg5[%c3, %c0_35] : memref<8x128xf32, #tpu.memory_space<vmem>>, vector<1x128xf32>
      %96 = arith.addf %95, %85 : vector<1x128xf32>
      %c3_36 = arith.constant 3 : index
      %c0_37 = arith.constant 0 : index
      %97 = vector.load %arg5[%c3_36, %c0_37] : memref<8x128xf32, #tpu.memory_space<vmem>>, vector<1x128xf32>
      tpu.vector_store %arg5[%c3_36, %c0_37], %96 {strides = array<i32>} : memref<8x128xf32, #tpu.memory_space<vmem>>, vector<1x128xf32>,
    } else {
    }
    %29 = arith.extui %25 : i1 to i32
    %c0_i32_11 = arith.constant 0 : i32
    %30 = arith.cmpi ne, %29, %c0_i32_11 : i32
    scf.if %30 {
      %31 = tpu.iota {dimensions = array<i32: 0>} : vector<8x1xi32>
      %c8_i32_12 = arith.constant 8 : i32
      %32 = arith.muli %1, %c8_i32_12 : i32
      %33 = vector.broadcast %32 : i32 to vector<8x1xi32>
      %34 = arith.addi %33, %31 : vector<8x1xi32>
      %c9_i32_13 = arith.constant 9 : i32
      %35 = vector.broadcast %c9_i32_13 : i32 to vector<8x1xi32>
      %36 = arith.cmpi slt, %34, %35 : vector<8x1xi32>
      %37 = tpu.iota {dimensions = array<i32: 1>} : vector<1x8xi32>
      %c8_i32_14 = arith.constant 8 : i32
      %38 = arith.muli %1, %c8_i32_14 : i32
      %39 = vector.broadcast %38 : i32 to vector<1x8xi32>
      %40 = arith.addi %39, %37 : vector<1x8xi32>
      %c9_i32_15 = arith.constant 9 : i32
      %41 = vector.broadcast %c9_i32_15 : i32 to vector<1x8xi32>
      %42 = arith.cmpi slt, %40, %41 : vector<1x8xi32>
      %43 = arith.extui %42 : vector<1x8xi1> to vector<1x8xi32>
      %44 = arith.sitofp %43 : vector<1x8xi32> to vector<1x8xf32>
      %45 = arith.truncf %44 : vector<1x8xf32> to vector<1x8xbf16>
      %cst = arith.constant 0.000000e+00 : f32
      %46 = vector.shape_cast %36 : vector<8x1xi1> to vector<8x1xi1>
      %47 = vector.broadcast %46 : vector<8x1xi1> to vector<8x128xi1>
      %48 = vector.broadcast %cst : f32 to vector<8x128xf32>
      %49 = arith.select %47, %5, %48 : vector<8x128xi1>, vector<8x128xf32>
      %cst_16 = arith.constant 0.000000e+00 : f32
      %50 = vector.shape_cast %36 : vector<8x1xi1> to vector<8x1xi1>
      %51 = vector.broadcast %50 : vector<8x1xi1> to vector<8x128xi1>
      %52 = vector.broadcast %cst_16 : f32 to vector<8x128xf32>
      %53 = arith.select %51, %6, %52 : vector<8x128xi1>, vector<8x128xf32>
      %c1_i32_17 = arith.constant 1 : i32
      %54 = tpu.dynamic_rotate %49 by %c1_i32_17 dim 1 : vector<8x128xf32>, i32 -> vector<8x128xf32>
      %c127_i32 = arith.constant 127 : i32
      %55 = tpu.dynamic_rotate %49 by %c127_i32 dim 1 : vector<8x128xf32>, i32 -> vector<8x128xf32>
      %56 = vector.shape_cast %17 : vector<1x128xi1> to vector<1x128xi1>
      %57 = vector.broadcast %56 : vector<1x128xi1> to vector<8x128xi1>
      %58 = arith.select %57, %54, %55 : vector<8x128xi1>, vector<8x128xf32>
      %59 = arith.maximumf %49, %58 : vector<8x128xf32>
      %c2_i32_18 = arith.constant 2 : i32
      %60 = tpu.dynamic_rotate %59 by %c2_i32_18 dim 1 : vector<8x128xf32>, i32 -> vector<8x128xf32>
      %c126_i32 = arith.constant 126 : i32
      %61 = tpu.dynamic_rotate %59 by %c126_i32 dim 1 : vector<8x128xf32>, i32 -> vector<8x128xf32>
      %62 = vector.shape_cast %22 : vector<1x128xi1> to vector<1x128xi1>
      %63 = vector.broadcast %62 : vector<1x128xi1> to vector<8x128xi1>
      %64 = arith.select %63, %60, %61 : vector<8x128xi1>, vector<8x128xf32>
      %65 = arith.maximumf %59, %64 : vector<8x128xf32>
      %66 = arith.subf %49, %65 : vector<8x128xf32>
      %67 = math.exp %66 : vector<8x128xf32>
      %68 = arith.truncf %67 : vector<8x128xf32> to vector<8x128xbf16>
      %69 = arith.extf %68 : vector<8x128xbf16> to vector<8x128xf32>
      %70 = arith.subf %67, %69 : vector<8x128xf32>
      %71 = arith.truncf %70 : vector<8x128xf32> to vector<8x128xbf16>
      %cst_19 = arith.constant dense<0.000000e+00> : vector<8x128xf32>
      %72 = tpu.matmul %68, %7, %cst_19 {dimension_numbers = #tpu.dot_dimension_numbers<[1], [0], [0], [1], [0, 0, 1, 1], [], []>} : vector<8x128xbf16>, vector<128x128xbf16>, vector<8x128xf32> -> vector<8x128xf32>
      %cst_20 = arith.constant dense<0.000000e+00> : vector<8x128xf32>
      %73 = tpu.matmul %71, %7, %cst_20 {dimension_numbers = #tpu.dot_dimension_numbers<[1], [0], [0], [1], [0, 0, 1, 1], [], []>} : vector<8x128xbf16>, vector<128x128xbf16>, vector<8x128xf32> -> vector<8x128xf32>
      %74 = arith.addf %72, %73 : vector<8x128xf32>
      %75 = arith.subf %49, %65 : vector<8x128xf32>
      %76 = math.log %74 : vector<8x128xf32>
      %77 = arith.subf %75, %76 : vector<8x128xf32>
      %78 = arith.cmpf oeq, %49, %65 : vector<8x128xf32>
      %cst_21 = arith.constant 4.000000e+00 : f32
      %79 = vector.shape_cast %12 : vector<1x128xf32> to vector<1x128xf32>
      %80 = vector.broadcast %79 : vector<1x128xf32> to vector<8x128xf32>
      %81 = vector.broadcast %cst_21 : f32 to vector<8x128xf32>
      %82 = arith.select %78, %80, %81 : vector<8x128xi1>, vector<8x128xf32>
      %c1_i32_22 = arith.constant 1 : i32
      %83 = tpu.dynamic_rotate %82 by %c1_i32_22 dim 1 : vector<8x128xf32>, i32 -> vector<8x128xf32>
      %c127_i32_23 = arith.constant 127 : i32
      %84 = tpu.dynamic_rotate %82 by %c127_i32_23 dim 1 : vector<8x128xf32>, i32 -> vector<8x128xf32>
      %85 = vector.shape_cast %17 : vector<1x128xi1> to vector<1x128xi1>
      %86 = vector.broadcast %85 : vector<1x128xi1> to vector<8x128xi1>
      %87 = arith.select %86, %83, %84 : vector<8x128xi1>, vector<8x128xf32>
      %88 = arith.minimumf %82, %87 : vector<8x128xf32>
      %c2_i32_24 = arith.constant 2 : i32
      %89 = tpu.dynamic_rotate %88 by %c2_i32_24 dim 1 : vector<8x128xf32>, i32 -> vector<8x128xf32>
      %c126_i32_25 = arith.constant 126 : i32
      %90 = tpu.dynamic_rotate %88 by %c126_i32_25 dim 1 : vector<8x128xf32>, i32 -> vector<8x128xf32>
      %91 = vector.shape_cast %22 : vector<1x128xi1> to vector<1x128xi1>
      %92 = vector.broadcast %91 : vector<1x128xi1> to vector<8x128xi1>
      %93 = arith.select %92, %89, %90 : vector<8x128xi1>, vector<8x128xf32>
      %94 = arith.minimumf %88, %93 : vector<8x128xf32>
      %95 = vector.broadcast %12 : vector<1x128xf32> to vector<8x128xf32>
      %96 = arith.cmpf oeq, %95, %94 : vector<8x128xf32>
      %97 = arith.extui %96 : vector<8x128xi1> to vector<8x128xi32>
      %98 = arith.sitofp %97 : vector<8x128xi32> to vector<8x128xf32>
      %99 = arith.truncf %98 : vector<8x128xf32> to vector<8x128xbf16>
      %100 = arith.truncf %53 : vector<8x128xf32> to vector<8x128xbf16>
      %101 = arith.mulf %100, %99 : vector<8x128xbf16>
      %cst_26 = arith.constant dense<0.000000e+00> : vector<1x128xf32>
      %102 = tpu.matmul %45, %101, %cst_26 {dimension_numbers = #tpu.dot_dimension_numbers<[1], [0], [0], [1], [0, 0, 1, 1], [], []>} : vector<1x8xbf16>, vector<8x128xbf16>, vector<1x128xf32> -> vector<1x128xf32>
      %cst_27 = arith.constant dense<0.000000e+00> : vector<1x128xf32>
      %103 = tpu.matmul %45, %99, %cst_27 {dimension_numbers = #tpu.dot_dimension_numbers<[1], [0], [0], [1], [0, 0, 1, 1], [], []>} : vector<1x8xbf16>, vector<8x128xbf16>, vector<1x128xf32> -> vector<1x128xf32>
      %cst_28 = arith.constant dense<0.000000e+00> : vector<1x128xf32>
      %104 = tpu.matmul %45, %100, %cst_28 {dimension_numbers = #tpu.dot_dimension_numbers<[1], [0], [0], [1], [0, 0, 1, 1], [], []>} : vector<1x8xbf16>, vector<8x128xbf16>, vector<1x128xf32> -> vector<1x128xf32>
      %105 = arith.mulf %53, %77 : vector<8x128xf32>
      %cst_29 = arith.constant dense<0.000000e+00> : vector<128xf32>
      %106 = vector.multi_reduction <add>, %105, %cst_29 [0] : vector<8x128xf32> to vector<128xf32>
      %107 = vector.shape_cast %106 : vector<128xf32> to vector<1x128xf32>
      %c0_30 = arith.constant 0 : index
      %c0_31 = arith.constant 0 : index
      %108 = vector.load %arg5[%c0_30, %c0_31] : memref<8x128xf32, #tpu.memory_space<vmem>>, vector<1x128xf32>
      %109 = arith.addf %108, %102 : vector<1x128xf32>
      %c0_32 = arith.constant 0 : index
      %c0_33 = arith.constant 0 : index
      %110 = vector.load %arg5[%c0_32, %c0_33] : memref<8x128xf32, #tpu.memory_space<vmem>>, vector<1x128xf32>
      tpu.vector_store %arg5[%c0_32, %c0_33], %109 {strides = array<i32>} : memref<8x128xf32, #tpu.memory_space<vmem>>, vector<1x128xf32>,
      %c1 = arith.constant 1 : index
      %c0_34 = arith.constant 0 : index
      %111 = vector.load %arg5[%c1, %c0_34] : memref<8x128xf32, #tpu.memory_space<vmem>>, vector<1x128xf32>
      %112 = arith.addf %111, %103 : vector<1x128xf32>
      %c1_35 = arith.constant 1 : index
      %c0_36 = arith.constant 0 : index
      %113 = vector.load %arg5[%c1_35, %c0_36] : memref<8x128xf32, #tpu.memory_space<vmem>>, vector<1x128xf32>
      tpu.vector_store %arg5[%c1_35, %c0_36], %112 {strides = array<i32>} : memref<8x128xf32, #tpu.memory_space<vmem>>, vector<1x128xf32>,
      %c2 = arith.constant 2 : index
      %c0_37 = arith.constant 0 : index
      %114 = vector.load %arg5[%c2, %c0_37] : memref<8x128xf32, #tpu.memory_space<vmem>>, vector<1x128xf32>
      %115 = arith.addf %114, %104 : vector<1x128xf32>
      %c2_38 = arith.constant 2 : index
      %c0_39 = arith.constant 0 : index
      %116 = vector.load %arg5[%c2_38, %c0_39] : memref<8x128xf32, #tpu.memory_space<vmem>>, vector<1x128xf32>
      tpu.vector_store %arg5[%c2_38, %c0_39], %115 {strides = array<i32>} : memref<8x128xf32, #tpu.memory_space<vmem>>, vector<1x128xf32>,
      %c3 = arith.constant 3 : index
      %c0_40 = arith.constant 0 : index
      %117 = vector.load %arg5[%c3, %c0_40] : memref<8x128xf32, #tpu.memory_space<vmem>>, vector<1x128xf32>
      %118 = arith.addf %117, %107 : vector<1x128xf32>
      %c3_41 = arith.constant 3 : index
      %c0_42 = arith.constant 0 : index
      %119 = vector.load %arg5[%c3_41, %c0_42] : memref<8x128xf32, #tpu.memory_space<vmem>>, vector<1x128xf32>
      tpu.vector_store %arg5[%c3_41, %c0_42], %118 {strides = array<i32>} : memref<8x128xf32, #tpu.memory_space<vmem>>, vector<1x128xf32>,
    } else {
    }
    return
  }
  func.func @transform_0(%arg0: i32, %arg1: i32) -> (i32, i32) {
    %c1_i32 = arith.constant 1 : i32
    %0 = arith.muli %arg0, %c1_i32 : i32
    %1 = arith.addi %0, %arg1 : i32
    %c1_i32_0 = arith.constant 1 : i32
    %2 = arith.minsi %1, %c1_i32_0 : i32
    %c0_i32 = arith.constant 0 : i32
    %c0_i32_1 = arith.constant 0 : i32
    return %2, %c0_i32 : i32, i32
  }
  func.func @transform_1(%arg0: i32, %arg1: i32) -> (i32, i32) {
    %c1_i32 = arith.constant 1 : i32
    %0 = arith.muli %arg0, %c1_i32 : i32
    %1 = arith.addi %0, %arg1 : i32
    %c1_i32_0 = arith.constant 1 : i32
    %2 = arith.minsi %1, %c1_i32_0 : i32
    %c0_i32 = arith.constant 0 : i32
    %c0_i32_1 = arith.constant 0 : i32
    return %2, %c0_i32 : i32, i32
  }
  func.func @transform_2(%arg0: i32, %arg1: i32) -> (i32, i32) {
    %c0_i32 = arith.constant 0 : i32
    %c0_i32_0 = arith.constant 0 : i32
    %c0_i32_1 = arith.constant 0 : i32
    return %c0_i32, %c0_i32_0 : i32, i32
  }
  func.func @transform_3(%arg0: i32, %arg1: i32) -> (i32, i32) {
    %c0_i32 = arith.constant 0 : i32
    %c0_i32_0 = arith.constant 0 : i32
    return %arg0, %c0_i32 : i32, i32
  }
}

</mosaic_0001>

<bundles_post_ra>
// kernel: tpu_custom_call.1
= control target key start
LH: loop header
LB: loop body
LE: loop exit
PB: predicated region body
PF: predicated region fallthrough
CT: control target
= control target key end

     0   :  { %s2258_s0 = inlined_call_operand.hbm [shape: f32[9,128], index: 0, kind: input, shape index: {}]   ;;  %s2259_s1 = inlined_call_operand.hbm [shape: f32[9,128], index: 1, kind: input, shape index: {}]   ;;  %s2260_s2 = inlined_call_operand.hbm [shape: bf16[128,128], index: 2, kind: input, shape index: {}]   ;;  %s2261_s3 = inlined_call_operand.hbm [shape: f32[16,128], index: 3, kind: output, shape index: {}]  }
   0x1   :  { %2269 = sst [smem:[#allocation17_spill]] %s2260_s2 }
   0x2   :  { %8 = vsyncpa [#allocation3], 0 }
   0x3   :  { %10 = vsyncpa [#allocation3 + $0x1], 0 }
   0x4   :  { %11 = vsyncpa [#allocation6], 0 }
   0x5   :  { %13 = vsyncpa [#allocation6 + $0x1], 0 }
   0x6   :  { %14 = vsyncpa [#allocation4], 0 }
   0x7   :  { %16 = vsyncpa [#allocation4 + $0x1], 0  ;;  %s1726_s12 = smov 0   ;;  %s1728_s13 = smov 0  }
   0x8   :  { %s1730_s14 = smov 0   ;;  %s1732_s15 = smov 0  }
   0x9   :  { %s1734_s16 = smov 0   ;;  %s1736_s17 = smov 0  }
   0xa   :  { %s1738_s18 = smov 0   ;;  %s1740_s19 = smov 0  }
   0xb   :  { %s1742_s20 = smov 0  }
   0xc LB: > { %2270 = sst [smem:[#allocation13_spill]] %s1668_s17  ;;  %s1770_s21 = sadd.s32 4294967295, %s1680_s20   ;;  %s1680_s20 = sphi %s1742_s20, %s22_s20   ;;  %s1676_s19 = sphi %s1740_s19, %s2292_s19   ;;  %s1672_s18 = sphi %s1738_s18, %s2291_s18   ;;  %s1668_s17 = sphi %s1736_s17, %s2290_s17   ;;  %s1664_s16 = sphi %s1734_s16, %s2297_s16   ;;  %s1660_s15 = sphi %s1732_s15, %s2296_s15   ;;  %s1656_s14 = sphi %s1730_s14, %s2295_s14   ;;  %s1652_s13 = sphi %s1728_s13, %s2294_s13   ;;  %s1648_s12 = sphi %s1726_s12, %s2293_s12  }
   0xd   : > { %2271 = sst [smem:[#allocation14_spill]] %s1676_s19  ;;  %s1134_s22 = sadd.s32 4294967294, %s1680_s20  }
   0xe   : > { %p60_p0 = scmp.ne.s32.totalorder %s1664_s16, %s1660_s15  ;;  %p2262_p1 = scmp.eq.s32.totalorder %s1770_s21, 0 }
   0xf   : > { %p136_p2 = scmp.ne.s32.totalorder %s1656_s14, %s1652_s13  ;;  %p137_p3 = scmp.eq.s32.totalorder %s1770_s21, 1 }
  0x10   : > { %p1780_p4 = por %p2262_p1, %p60_p0  ;;  %p142_p5 = scmp.ne.s32.totalorder %s1652_s13, %s1648_s12 }
  0x11   : > { %p1786_p6 = por %p137_p3, %p136_p2  ;;  %p143_p7 = scmp.eq.s32.totalorder %s1134_s22, 1 }
  0x12   : > { %s2272_s23 = scalar_select %p1780_p4, 1, 0 }
  0x13   : > { %s2273_s24 = scalar_select %p1786_p6, 1, 0 }
  0x14   : > { %p1135_p8 = scmp.ge.s32.totalorder %s1680_s20, 1  ;;  %p150_p9 = scmp.lt.s32.totalorder %s1680_s20, 3 }
  0x15   : > { %p1792_p10 = por %p143_p7, %p142_p5  ;;  %s1682_s27 = smov [#allocation7]  }
  0x16   : > { %p1796_p11 = pnand %p1135_p8, %p150_p9  ;;  %s162_s28 = sshll.u32 %s1682_s27, 4  ;;  %s163_s28 = int_to_ptr.vmem [resolvable:$true] %s162_s28 }
  0x17   : > { %s2274_s25 = scalar_select %p1792_p10, 1, 0 }
  0x18   : > { %s2275_s26 = scalar_select %p1796_p11, 1, 0 }
  0x19   : > { %p1358_p12 = pneg %p1796_p11  ;;  %s2277_s2 = sld [smem:[#allocation17_spill]] }
  0x1b   : > { %p1805_p0 = pnand %p1358_p12, %p2262_p1 }
  0x1d   : > { %p1480_p3 = pneg %p1805_p0 }
  0x1f   : > { %s1478_s5 = scalar_lea.hbm %s2277_s2, 1024 }
  0x20   : > { %p1479_p2 = scmp.ne.s32.totalorder %s2277_s2, %s1478_s5  ;;  %p1485_p8 = scmp.lt.u32.totalorder %s1478_s5, %s2277_s2 }
  0x22   : > { %p1481_p5 = pnand %p1480_p3, %p1479_p2 }
  0x24   : > { %p1482_p7 = pneg %p1481_p5 }
  0x26   : > { %p1487_p9 = pnand %p1485_p8, %p1482_p7 }
  0x28   : > { %1490 = shalt.err (!%p1487_p9)
}
  0x29   : > { %s1491_s10 = scalar_lea.vmem %s163_s28, 1024  ;;  %p1499_p10 = scmp.lt.s32.totalorder %s163_s28, %s163_s28 }
  0x2a   : > { %p1492_p12 = scmp.ne.s32.totalorder %s163_s28, %s1491_s10  ;;  %p1500_p6 = scmp.lt.s32.totalorder %s1491_s10, %s1491_s10 }
  0x2c   : > { %p1494_p13 = pnand %p1492_p12, %p1480_p3  ;;  %p1501_p4 = por %p1500_p6, %p1499_p10 }
  0x2e   : > { %p1495_p1 = pneg %p1494_p13 }
  0x30   : > { %p1502_p11 = pnand %p1501_p4, %p1495_p1 }
  0x32   : > { %1505 = shalt.err (!%p1502_p11)
}
  0x33   : > { %s1683_s11 = smov 64   ;;  %s1684_s15 = smov 4  }
  0x34   : > { %1361 = dma.hbm_to_vmem [thread:$0]  (!%p1805_p0), %s2277_s2, 1024, %s163_s28, [#allocation6], %s1683_s11, %s1683_s11, %s1684_s15  }
  0x35   : > { %s34_s30 = sadd.s32 1, %s1676_s19  ;;  %p39_p1 = scmp.lt.s32.totalorder %s1676_s19, 1 }
  0x36   : > { %p36_p4 = scmp.ge.s32.totalorder %s34_s30, 2  ;;  %s47_s4 = sadd.s32 1, %s1668_s17 }
  0x37   : > { %s40_s5 = scalar_select %p39_p1, %s1676_s19, 1 }
  0x38   : > { %s2299_s30 = smov (%p36_p4, %s34_s30), 0  ;;  %p54_p6 = scmp.ne.s32.totalorder %s1668_s17, %s1664_s16 }
  0x39   : > { %2278 = sst [smem:[#allocation15_spill]] %s2299_s30  ;;  %p55_p10 = scmp.eq.s32.totalorder %s1680_s20, 0 }
  0x3a   : > { %p42_p11 = scmp.lt.s32.totalorder %s2299_s30, 1  ;;  %s123_s29 = ssub.s32 %s1676_s19, %s2299_s30 }
  0x3b   : > { %p1837_p13 = por %p55_p10, %p54_p6  ;;  %p124_p0 = scmp.eq.s32.totalorder %s123_s29, 0 }
  0x3c   : > { %s43_s28 = scalar_select %p42_p11, %s2299_s30, 1 }
  0x3d   : > { %s126_s7 = sadd.s32 1, %s1656_s14  ;;  %p1374_p2 = scmp.lt.s32.totalorder %s1680_s20, 2 }
  0x3e   : > { %s44_s8 = ssub.s32 %s40_s5, %s43_s28  ;;  %s176_s9 = sand.u32 1, %s1668_s17  }
  0x3f   : > { %p45_p3 = scmp.eq.s32.totalorder %s44_s8, 0  ;;  %s1851_s15 = sshll.u32 %s176_s9, 3 }
  0x40   : > { %s1846_s10 = scalar_select %p124_p0, %s1656_s14, %s126_s7  }
  0x41   : > { %s1849_s11 = scalar_select %p45_p3, %s1668_s17, %s47_s4  }
  0x42   : > { %s1139_s22 = sshll.u32 %s40_s5, 7  ;;  %s180_s29 = scalar_lea.vmem [#allocation2], %s1851_s15 }
  0x43   : > { %2280 = sst [smem:[#allocation16_spill]] %s1849_s11  ;;  %s1856_s19 = scalar_lea.hbm %s2258_s0, %s1139_s22 }
  0x44   : > { %s190_s28 = sshll.u32 %s180_s29, 4  ;;  %p1861_p5 = pnand %p1374_p2, %p1837_p13  ;;  %s1865_s28 = int_to_ptr.vmem [resolvable:$true] %s190_s28 }
  0x45   : > { %s1870_s2 = scalar_lea.hbm %s2259_s1, %s1139_s22  ;;  %s177_s8 = scalar_lea.sflag [#allocation3], %s176_s9 }
  0x46   : > { %s1506_s27 = scalar_lea.hbm %s1856_s19, 128  ;;  %p1508_p8 = pneg %p1861_p5 }
  0x47   : > { %p1507_p7 = scmp.ne.s32.totalorder %s1856_s19, %s1506_s27  ;;  %s1511_s30 = scalar_lea.hbm %s2258_s0, 256 }
  0x48   : > { %p1512_p1 = scmp.lt.u32.totalorder %s1856_s19, %s2258_s0  ;;  %p1513_p4 = scmp.lt.u32.totalorder %s1511_s30, %s1506_s27 }
  0x49   : > { %p1509_p9 = pnand %p1508_p8, %p1507_p7  ;;  %p1515_p10 = scmp.lt.u32.totalorder %s1506_s27, %s1856_s19 }
  0x4a   : > { %p1514_p6 = por %p1513_p4, %p1512_p1 }
  0x4b   : > { %p1510_p12 = pneg %p1509_p9 }
  0x4c   : > { %p1516_p11 = por %p1515_p10, %p1514_p6 }
  0x4e   : > { %p1517_p13 = pnand %p1516_p11, %p1510_p12 }
  0x50   : > { %1520 = shalt.err (!%p1517_p13)
}
  0x51   : > { %s1521_s9 = scalar_lea.vmem %s1865_s28, 128  ;;  %s1685_s22 = smov [#allocation2]  }
  0x52   : > { %p1522_p0 = scmp.ne.s32.totalorder %s1865_s28, %s1521_s9  ;;  %s1526_s4 = sshll.u32 %s1685_s22, 4  ;;  %s1527_s4 = int_to_ptr.vmem [resolvable:$false] %s1526_s4 }
  0x53   : > { %s1528_s17 = scalar_lea.vmem %s1527_s4, 256  ;;  %p1529_p7 = scmp.lt.s32.totalorder %s1865_s28, %s1527_s4 }
  0x54   : > { %p1524_p2 = pnand %p1522_p0, %p1508_p8  ;;  %p1530_p9 = scmp.lt.s32.totalorder %s1528_s17, %s1521_s9 }
  0x56   : > { %p1525_p3 = pneg %p1524_p2  ;;  %p1531_p1 = por %p1530_p9, %p1529_p7 }
  0x58   : > { %p1532_p4 = pnand %p1531_p1, %p1525_p3 }
  0x5a   : > { %1535 = shalt.err (!%p1532_p4)
}
  0x5b   : > { %1365 = dma.hbm_to_vmem [thread:$0]  (!%p1861_p5), %s1856_s19, 128, %s1865_s28, %s177_s8  }
  0x5c   : > { %s197_s30 = sand.u32 1, %s1680_s20   ;;  %s201_s11 = scalar_lea.vmem [#allocation5], %s1851_s15 }
  0x5d   : > { %s211_s5 = sshll.u32 %s201_s11, 4  ;;  %s198_s27 = scalar_lea.sflag [#allocation6], %s197_s30  ;;  %s212_s5 = int_to_ptr.vmem [resolvable:$true] %s211_s5 }
  0x5e   : > { %s1536_s6 = scalar_lea.hbm %s1870_s2, 128  ;;  %s1541_s22 = scalar_lea.hbm %s2259_s1, 256 }
  0x5f   : > { %p1537_p12 = scmp.ne.s32.totalorder %s1870_s2, %s1536_s6  ;;  %p1542_p11 = scmp.lt.u32.totalorder %s1870_s2, %s2259_s1 }
  0x60   : > { %p1543_p13 = scmp.lt.u32.totalorder %s1541_s22, %s1536_s6  ;;  %p1545_p2 = scmp.lt.u32.totalorder %s1536_s6, %s1870_s2 }
  0x61   : > { %p1539_p6 = pnand %p1537_p12, %p1508_p8 }
  0x62   : > { %p1544_p0 = por %p1543_p13, %p1542_p11 }
  0x63   : > { %p1540_p10 = pneg %p1539_p6 }
  0x64   : > { %p1546_p3 = por %p1545_p2, %p1544_p0 }
  0x66   : > { %p1547_p7 = pnand %p1546_p3, %p1540_p10 }
  0x68   : > { %1550 = shalt.err (!%p1547_p7)
}
  0x69   : > { %s1551_s19 = scalar_lea.vmem %s212_s5, 128  ;;  %s1686_s15 = smov [#allocation5]  }
  0x6a   : > { %p1552_p9 = scmp.ne.s32.totalorder %s212_s5, %s1551_s19  ;;  %s1556_s28 = sshll.u32 %s1686_s15, 4  ;;  %s1557_s28 = int_to_ptr.vmem [resolvable:$false] %s1556_s28 }
  0x6b   : > { %s1558_s8 = scalar_lea.vmem %s1557_s28, 256  ;;  %p1559_p12 = scmp.lt.s32.totalorder %s212_s5, %s1557_s28 }
  0x6c   : > { %p1554_p1 = pnand %p1552_p9, %p1508_p8  ;;  %p1560_p6 = scmp.lt.s32.totalorder %s1558_s8, %s1551_s19 }
  0x6e   : > { %p1555_p4 = pneg %p1554_p1  ;;  %p1561_p11 = por %p1560_p6, %p1559_p12 }
  0x70   : > { %p1562_p13 = pnand %p1561_p11, %p1555_p4 }
  0x72   : > { %1565 = shalt.err (!%p1562_p13)
}
  0x73   : > { %1368 = dma.hbm_to_vmem [thread:$0]  (!%p1861_p5), %s1870_s2, 128, %s212_s5, %s198_s27  }
  0x74   : > { %p2282_p10 = scmp.ne.s32.totalorder %s2275_s26, 0 }
  0x75   : > { %s222_s30 = sand.u32 (!%p2282_p10), 1, %s1664_s16   ;;  %p2283_p8 = scmp.ne.s32.totalorder (!%p2282_p10), %s2272_s23, 0 }
  0x76   : > { %220 = sbr.rel (%p2282_p10) target bundleno = 1602 (0x642), region = 32  ;;  %s1143_s11 = sshll.u32 (!%p2282_p10), %s222_s30, 3 }
  0x77   : > { %s223_s6 = scalar_lea.sflag (!%p2282_p10), [#allocation3], %s222_s30  ;;  %s226_s29 = scalar_lea.vmem (!%p2282_p10), [#allocation2], %s1143_s11 }
  0x7d   : > { %1631 = dma.done.wait (%p2283_p8), %s223_s6, 128  }
  0x7e   : > { %1633 = vsyncadd (%p2283_p8), %s223_s6, 4294967168  ;;  %s231_s9 = sand.u32 1, %s1770_s21   ;;  %s235_s22 = scalar_lea.vmem [#allocation5], %s1143_s11 }
  0x7f   : > { %s232_s7 = scalar_lea.sflag [#allocation6], %s231_s9 }
  0x80   : > { %1635 = dma.done.wait (%p2283_p8), %s232_s7, 128  }
  0x81   : > { %1637 = vsyncadd (%p2283_p8), %s232_s7, 4294967168  ;;  %v299_v0 = vlaneseq  ;;  %p2284_p5 = scmp.eq.s32.totalorder %s1770_s21, 0 }
  0x83   : > { %1639 = dma.done.wait (%p2284_p5), [#allocation6], 1024   ;;  %p2285_p0 = pmov %p2284_p5 }
  0x84   : > { %s264_s26 = sand.u32 1, %s1652_s13   ;;  %s1180_s2 = sshll.u32 %s1672_s18, 3  ;;  %v1937_v1 = vand.u32 127, %v299_v0  ;;  %v1687_v4 = vmov 0.0   ;;  %v1952_v6 = vld [vmem:[%s226_s29] sm:$0xff]  ;;  %v1954_v7 = vld [vmem:[%s235_s22] sm:$0xff] }
  0x85   : > { %1641 = vsyncadd (%p2285_p0), [#allocation6], 4294966272  ;;  %s1146_s5 = sshll.u32 %s264_s26, 3  ;;  %s1943_s23 = sadd.s32 8, %s1180_s2  ;;  %v1956_v8 = vld [vmem:[#allocation7] sm:$0xf] }
  0x86   : > { %v301_v2 = vcvt.s32.f32 %v1937_v1  ;;  %v302_v3 = vand.u32 3, %v1937_v1  ;;  %s1947_s21 = scalar_lea.vmem [#allocation8], %s1146_s5  ;;  %s1688_s27 = smov 1   ;;  %v1958_v9 = vld [vmem:[#allocation7 + $0x4] sm:$0xf]  ;;  %v306_v24 = vxor.u32 1, %v1937_v1 }
  0x87   : > { %280 = vst [vmem:[%s1947_s21] sm:$0xff] %v1687_v4  ;;  %v1960_v10 = vld [vmem:[#allocation7 + $0x8] sm:$0xf]  ;;  %v1962_v11 = vld [vmem:[#allocation7 + $0xc] sm:$0xf]  ;;  %v1964_v12 = vld [vmem:[#allocation7 + $0x10] sm:$0xf] }
  0x88   : > { %v1950_v5 = vcvt.s32.f32 %v302_v3  ;;  %304 = vrot.lane.b32.xlu0 %v301_v2, %s1688_s27  ;;  %v1966_v13 = vld [vmem:[#allocation7 + $0x14] sm:$0xf]  ;;  %v1968_v14 = vld [vmem:[#allocation7 + $0x18] sm:$0xf]  ;;  %s1689_s4 = smov 2   ;;  %v1989_v25 = vcvt.s32.f32 %v306_v24  ;;  %v311_v26 = vxor.u32 2, %v1937_v1 }
  0x89   : > { %v1970_v15 = vld [vmem:[#allocation7 + $0x1c] sm:$0xf]  ;;  %v1972_v16 = vld [vmem:[#allocation7 + $0x20] sm:$0xf]  ;;  %v1974_v17 = vld [vmem:[#allocation7 + $0x24] sm:$0xf] }
  0x8a   : > { %v1976_v18 = vld [vmem:[#allocation7 + $0x28] sm:$0xf]  ;;  %v1978_v19 = vld [vmem:[#allocation7 + $0x2c] sm:$0xf]  ;;  %v1980_v20 = vld [vmem:[#allocation7 + $0x30] sm:$0xf]  ;;  %v1996_v28 = vcvt.s32.f32 %v311_v26 }
  0x8b   : > { %v1982_v21 = vld [vmem:[#allocation7 + $0x34] sm:$0xf]  ;;  %v1984_v22 = vld [vmem:[#allocation7 + $0x38] sm:$0xf]  ;;  %v1986_v23 = vld [vmem:[#allocation7 + $0x3c] sm:$0xf] }
  0x8c   : > { %309 = vrot.lane.b32.xlu0 %v301_v2, %s1689_s4  ;;  %p1148_p2 = scmp.gt.s32.totalorder %s1943_s23, 9 }
  0x8d   : > { %v1149_v30 = vcombine.low (!%p1148_p2), %v1956_v8, %v1958_v9  ;;  %s1690_s17 = smov (!%p1148_p2), 1   ;;  %v1691_v31 = vmov (!%p1148_p2), 0.0   ;;  %v1150_v32 = vcombine.low (!%p1148_p2), %v1960_v10, %v1962_v11  ;;  %s1692_s19 = smov (!%p1148_p2), 127   ;;  %v327_v33 = vshrl.u32 (!%p1148_p2), %v299_v0, 7 }
  0x8e   : > { %1250 = vmatprep.subr.bf16.mxu0 (!%p1148_p2), %v1691_v31  ;;  %1230 = vmatprep.subr.bf16.mxu1 (!%p1148_p2), %v1691_v31  ;;  %v1151_v35 = vcombine.low (!%p1148_p2), %v1964_v12, %v1966_v13  ;;  %v1693_v36 = vmov (!%p1148_p2), 0   ;;  %v1152_v39 = vcombine.low (!%p1148_p2), %v1968_v14, %v1970_v15  ;;  %v1153_v41 = vcombine.low (!%p1148_p2), %v1972_v16, %v1974_v17  ;;  %s1694_s15 = smov (!%p1148_p2), 2   ;;  %s1696_s28 = smov (!%p1148_p2), 126  }
  0x8f   : > { %1251 = vmatpush3.bf16.msra.mxu0 (!%p1148_p2), %v1149_v30  ;;  %1231 = vmatpush3.bf16.msra.mxu1 (!%p1148_p2), %v1149_v30  ;;  %v328_v34 = vsub.s32 (!%p1148_p2), 0, %v327_v33  ;;  %v1154_v45 = vcombine.low (!%p1148_p2), %v1976_v18, %v1978_v19  ;;  %v1155_v46 = vcombine.low (!%p1148_p2), %v1980_v20, %v1982_v21  ;;  %vm1695_vm3 = vmmov (!%p1148_p2), 0  }
  0x90   : > { %321 = vrot.lane.b32.xlu0 (!%p1148_p2), %v1952_v6, %s1690_s17  ;;  %1252 = vmatprep.subr.bf16.mxu0 (!%p1148_p2), %v1691_v31  ;;  %v1156_v47 = vcombine.low (!%p1148_p2), %v1984_v22, %v1986_v23  ;;  %vm507_vm7 = vcmask (!%p1148_p2), 1043456   ;;  %vm503_vm8 = vcmask (!%p1148_p2), 64512  }
  0x91   : > { %1232 = vmatprep.subr.bf16.mxu1 (!%p1148_p2), %v1691_v31  ;;  %1266 = vmatprep.mubr.msk.bf16.mxu0 (!%p1148_p2), %vm1695_vm3, %v1691_v31 }
  0x92   : > { %1246 = vmatprep.mubr.msk.bf16.mxu1 (!%p1148_p2), %vm1695_vm3, %v1691_v31 }
  0x93   : > { %1253 = vmatpush3.bf16.msra.mxu0 (!%p1148_p2), %v1150_v32  ;;  %1233 = vmatpush3.bf16.msra.mxu1 (!%p1148_p2), %v1150_v32 }
  0x94   : > { %323 = vrot.lane.b32.xlu0 (!%p1148_p2), %v1952_v6, %s1692_s19  ;;  %1254 = vmatprep.subr.bf16.mxu0 (!%p1148_p2), %v1691_v31 }
  0x95   : > { %1234 = vmatprep.subr.bf16.mxu1 (!%p1148_p2), %v1691_v31 }
  0x97   : > { %1255 = vmatpush3.bf16.msra.mxu0 (!%p1148_p2), %v1151_v35  ;;  %1235 = vmatpush3.bf16.msra.mxu1 (!%p1148_p2), %v1151_v35 }
  0x98   : > { %1256 = vmatprep.subr.bf16.mxu0 (!%p1148_p2), %v1691_v31  ;;  %1236 = vmatprep.subr.bf16.mxu1 (!%p1148_p2), %v1691_v31 }
  0x9b   : > { %1257 = vmatpush3.bf16.msra.mxu0 (!%p1148_p2), %v1152_v39  ;;  %1237 = vmatpush3.bf16.msra.mxu1 (!%p1148_p2), %v1152_v39 }
  0x9c   : > { %1258 = vmatprep.subr.bf16.mxu0 (!%p1148_p2), %v1691_v31  ;;  %1238 = vmatprep.subr.bf16.mxu1 (!%p1148_p2), %v1691_v31 }
  0x9f   : > { %1259 = vmatpush3.bf16.msra.mxu0 (!%p1148_p2), %v1153_v41  ;;  %1239 = vmatpush3.bf16.msra.mxu1 (!%p1148_p2), %v1153_v41  ;;  %v501_v41 = vpack.c.bf16 (!%p1148_p2), %v1954_v7, %v1954_v7 }
  0xa0   : > { %1260 = vmatprep.subr.bf16.mxu0 (!%p1148_p2), %v1691_v31  ;;  %1240 = vmatprep.subr.bf16.mxu1 (!%p1148_p2), %v1691_v31 }
  0xa3   : > { %1261 = vmatpush3.bf16.msra.mxu0 (!%p1148_p2), %v1154_v45  ;;  %1241 = vmatpush3.bf16.msra.mxu1 (!%p1148_p2), %v1154_v45 }
  0xa4   : > { %1262 = vmatprep.subr.bf16.mxu0 (!%p1148_p2), %v1691_v31  ;;  %1242 = vmatprep.subr.bf16.mxu1 (!%p1148_p2), %v1691_v31 }
  0xa7   : > { %1263 = vmatpush3.bf16.msra.mxu0 (!%p1148_p2), %v1155_v46  ;;  %1243 = vmatpush3.bf16.msra.mxu1 (!%p1148_p2), %v1155_v46 }
  0xa8   : > { %1264 = vmatprep.subr.bf16.mxu0 (!%p1148_p2), %v1691_v31  ;;  %1244 = vmatprep.subr.bf16.mxu1 (!%p1148_p2), %v1691_v31 }
  0xab   : > { %1265 = vmatpush3.bf16.msra.mxu0 (!%p1148_p2), %v1156_v47  ;;  %1245 = vmatpush3.bf16.msra.mxu1 (!%p1148_p2), %v1156_v47  ;;  %v595_v47 = vsel (!%p1148_p2), %vm507_vm7, %v501_v41, 0 }
  0xac   : > { %1270 = vmatprep.subr.bf16.mxu0 (!%p1148_p2), %v1691_v31  ;;  %1276 = vmatprep.subr.bf16.mxu1 (!%p1148_p2), %v1691_v31 }
  0xf9   : > { %320 = sbr.rel (%p1148_p2) target bundleno = 857 (0x359), region = 52 }
  0xfa   : > { %v1992_v27 = vpop.permute.xlu0 %304 }
  0xfb   : > { %vm308_vm0 = vcmp.eq.f32.partialorder %v1992_v27, %v1989_v25 }
  0xfc   : > { %v325_v37 = vsel (!%p1148_p2), %vm308_vm0, 1, %v1693_v36 }
  0xfd   : > { %v2025_v38 = vrot.slane (!%p1148_p2), %v325_v37, %v328_v34 }
  0xfe   : > { %v1998_v29 = vpop.permute.xlu0 %309 }
  0xff   : > { %vm313_vm1 = vcmp.eq.f32.partialorder %v1998_v29, %v1996_v28  ;;  %vm330_vm2 = vcmp.eq.s32.totalorder (!%p1148_p2), %v2025_v38, 1 }
 0x100   : > { %v337_v48 = vsel %vm313_vm1, 1, %v1693_v36 }
 0x101   : > { %v341_v49 = vrot.slane %v337_v48, %v328_v34  ;;  %v1697_v48 = vmov 1065369472  }
 0x102   : > { %v322_v40 = vpop.permute.xlu0 %321 }
 0x103   : > { %vm342_vm4 = vcmp.eq.s32.totalorder %v341_v49, 1 }
 0x106   : > { %v324_v42 = vpop.permute.xlu0 %323 }
 0x107   : > { %v331_v43 = vsel %vm330_vm2, %v322_v40, %v324_v42 }
 0x108   : > { %v332_v44 = vmax.f32 %v1952_v6, %v331_v43 }
 0x10a   : > { %333 = vrot.lane.b32.xlu1 %v332_v44, %s1694_s15 }
 0x10e   : > { %335 = vrot.lane.b32.xlu1 %v332_v44, %s1696_s28 }
 0x17c   : > { %v334_v50 = vpop.permute.xlu1 %333 }
 0x180   : > { %v336_v51 = vpop.permute.xlu1 %335 }
 0x181   : > { %v343_v52 = vsel %vm342_vm4, %v334_v50, %v336_v51 }
 0x182   : > { %v344_v53 = vmax.f32 %v332_v44, %v343_v52 }
 0x184   : > { %v345_v54 = vsub.f32 %v1952_v6, %v344_v53  ;;  %vm483_vm5 = vcmp.eq.f32.partialorder %v1952_v6, %v344_v53 }
 0x185   : > { %v484_v55 = vsel %vm483_vm5, %v1950_v5, 4.0 }
 0x186   : > { %v346_v56 = vmul.f32 1.442695, %v345_v54  ;;  %487 = vrot.lane.b32.xlu1 %v484_v55, %s1692_s19  ;;  %485 = vrot.lane.b32.xlu0 %v484_v55, %s1690_s17 }
 0x188   : > { %1470 = vpow2.f32 %v346_v56 }
 0x192   : > { %v1471_v57 = vpop.eup %1470 }
 0x193   : > { %v348_v58 = vpack.c.bf16 %v1471_v57, %v1471_v57 }
 0x195   : > { %v349_v59 = vunpack.c.l.bf16 %v348_v58  ;;  %1267 = vmatmul.mubr.bf16.vlgmr.msra.gmra.mrb[0].mxu0 %v348_v58 }
 0x196   : > { %1272 = vmatprep.mubr.msk.bf16.mxu0 %vm1695_vm3, %v1691_v31 }
 0x197   : > { %v350_v60 = vsub.f32 %v1471_v57, %v349_v59  ;;  %v653_v59 = vld [vmem:[%s1947_s21 + $0x3] sm:$0x1] }
 0x199   : > { %v351_v61 = vpack.c.bf16 %v350_v60, %v350_v60 }
 0x19b   : > { %1247 = vmatmul.mubr.bf16.vlgmr.msra.gmra.mrb[0].mxu1 %v351_v61 }
 0x19c   : > { %1278 = vmatprep.mubr.msk.bf16.mxu1 %vm1695_vm3, %v1691_v31 }
 0x1f8   : > { %v488_v62 = vpop.permute.xlu1 %487  ;;  %v486_v63 = vpop.permute.xlu0 %485 }
 0x1f9   : > { %v489_v2 = vsel %vm330_vm2, %v486_v63, %v488_v62  ;;  %v644_v63 = vld [vmem:[%s1947_s21] sm:$0x1] }
 0x1fa   : > { %v490_v3 = vmin.f32 %v484_v55, %v489_v2 }
 0x1fc   : > { %493 = vrot.lane.b32.xlu1 %v490_v3, %s1696_s28  ;;  %491 = vrot.lane.b32.xlu0 %v490_v3, %s1694_s15 }
 0x268   : > { %v474_v4 = vpop.f32.mrb[0].mxu0 }
 0x269   : > { %v1268_v24 = vpop.f32.mrb[1].mxu0 }
 0x26a   : > { %v477_v26 = vpop.f32.mrb[2].mxu0 }
 0x26b   : > { %v1269_v30 = vpop.f32.mrb[3].mxu0 }
 0x26e   : > { %v494_v32 = vpop.permute.xlu1 %493  ;;  %v492_v33 = vpop.permute.xlu0 %491 }
 0x26f   : > { %v495_v34 = vsel %vm342_vm4, %v492_v33, %v494_v32  ;;  %v434_v35 = vpop.f32.mrb[0].mxu1 }
 0x270   : > { %v496_v36 = vmin.f32 %v490_v3, %v495_v34  ;;  %v475_v37 = vadd.f32 %v474_v4, %v434_v35  ;;  %v1248_v39 = vpop.f32.mrb[1].mxu1  ;;  %v650_v34 = vld [vmem:[%s1947_s21 + $0x2] sm:$0x1] }
 0x271   : > { %v437_v40 = vpop.f32.mrb[2].mxu1 }
 0x272   : > { %vm497_vm6 = vcmp.eq.f32.partialorder %v1950_v5, %v496_v36  ;;  %1472 = vlog2.f32 %v475_v37  ;;  %v1249_v38 = vpop.f32.mrb[3].mxu1 }
 0x273   : > { %v1157_v42 = vsel %vm497_vm6, 1.0, %v1691_v31 }
 0x274   : > { %v500_v43 = vpack.c.bf16 %v1157_v42, %v1157_v42 }
 0x276   : > { %v552_v44 = vsel %vm507_vm7, %v500_v43, 0  ;;  %v502_v45 = vmul.bf16 %v501_v41, %v500_v43 }
 0x277   : > { %1277 = vmatpush3.bf16.msra.mxu1 %v552_v44 }
 0x278   : > { %v509_v46 = vsel %vm507_vm7, %v502_v45, 0  ;;  %1282 = vmatprep.subr.bf16.mxu1 %v1691_v31 }
 0x279   : > { %1271 = vmatpush3.bf16.msra.mxu0 %v509_v46 }
 0x27a   : > { %1279 = vmatmul.mubr.msk.bf16.vlgmr.msra.gmra.mrb[4].mxu1 %vm503_vm8, %v1697_v48 }
 0x27b   : > { %1283 = vmatpush3.bf16.msra.mxu1 %v595_v47  ;;  %1284 = vmatprep.mubr.msk.bf16.mxu1 %vm1695_vm3, %v1691_v31  ;;  %v647_v31 = vld [vmem:[%s1947_s21 + $0x1] sm:$0x1] }
 0x27c   : > { %v1473_v49 = vpop.eup %1472  ;;  %1273 = vmatmul.mubr.msk.bf16.vlgmr.msra.gmra.mrb[4].mxu0 %vm503_vm8, %v1697_v48 }
 0x27d   : > { %v481_v50 = vmul.f32 0.6931472, %v1473_v49 }
 0x27f   : > { %v482_v51 = vsub.f32 %v345_v54, %v481_v50 }
 0x281   : > { %v637_v52 = vmul.f32 %v482_v51, %v1954_v7 }
 0x282   : > { %1285 = vmatmul.mubr.msk.bf16.vlgmr.msra.gmra.mrb[8].mxu1 %vm503_vm8, %v1697_v48 }
 0x283   : > { %v638_v53 = vrot.slane %v637_v52, 4 }
 0x285   : > { %v639_v55 = vadd.f32 %v638_v53, %v637_v52 }
 0x287   : > { %v640_v56 = vrot.slane %v639_v55, 2 }
 0x289   : > { %v641_v57 = vadd.f32 %v640_v56, %v639_v55 }
 0x28b   : > { %v642_v58 = vrot.slane %v641_v57, 1 }
 0x28d   : > { %v643_v60 = vadd.f32 %v642_v58, %v641_v57 }
 0x28f   : > { %v654_v61 = vadd.f32 %v653_v59, %v643_v60 }
 0x291   : > { %655 = vst [vmem:[%s1947_s21 + $0x3] sm:$0x1] %v654_v61 }
 0x34d   : > { %v588_v62 = vpop.f32.mrb[4].mxu1 }
 0x34e   : > { %v648_v2 = vadd.f32 %v647_v31, %v588_v62  ;;  %v1280_v54 = vpop.f32.mrb[5].mxu1 }
 0x34f   : > { %v591_v3 = vpop.f32.mrb[6].mxu1  ;;  %v545_v4 = vpop.f32.mrb[4].mxu0 }
 0x350   : > { %649 = vst [vmem:[%s1947_s21 + $0x1] sm:$0x1] %v648_v2  ;;  %v1281_v24 = vpop.f32.mrb[7].mxu1  ;;  %v645_v26 = vadd.f32 %v644_v63, %v545_v4  ;;  %v1274_v30 = vpop.f32.mrb[5].mxu0 }
 0x351   : > { %v548_v32 = vpop.f32.mrb[6].mxu0 }
 0x352   : > { %646 = vst [vmem:[%s1947_s21] sm:$0x1] %v645_v26  ;;  %v1275_v33 = vpop.f32.mrb[7].mxu0 }
 0x355   : > { %v631_v35 = vpop.f32.mrb[8].mxu1 }
 0x356   : > { %v651_v36 = vadd.f32 %v650_v34, %v631_v35  ;;  %v1286_v37 = vpop.f32.mrb[9].mxu1 }
 0x357   : > { %v634_v39 = vpop.f32.mrb[10].mxu1 }
 0x358   : > { %652 = vst [vmem:[%s1947_s21 + $0x2] sm:$0x1] %v651_v36  ;;  %v1287_v40 = vpop.f32.mrb[11].mxu1 }
 0x359 PF: > { %p1161_p3 = scmp.le.s32.totalorder %s1943_s23, 9 }
 0x35a   : > { %v2093_v38 = vshrl.u32 (!%p1161_p3), %v299_v0, 7  ;;  %v2097_v41 = vstv (!%p1161_p3), %s1180_s2  ;;  %v1698_v42 = vmov (!%p1161_p3), 0.0   ;;  %v1164_v44 = vcombine.low (!%p1161_p3), %v1956_v8, %v1958_v9  ;;  %s1699_s8 = smov (!%p1161_p3), 1   ;;  %s1700_s30 = smov (!%p1161_p3), 127  }
 0x35b   : > { %658 = sbr.rel (%p1161_p3) target bundleno = 1577 (0x629), region = 56  ;;  %1308 = vmatprep.subr.bf16.mxu0 (!%p1161_p3), %v1698_v42  ;;  %1288 = vmatprep.subr.bf16.mxu1 (!%p1161_p3), %v1698_v42  ;;  %v1165_v45 = vcombine.low (!%p1161_p3), %v1960_v10, %v1962_v11  ;;  %v1166_v8 = vcombine.low (!%p1161_p3), %v1964_v12, %v1966_v13  ;;  %v1701_v9 = vmov (!%p1161_p3), 0   ;;  %v1167_v46 = vcombine.low (!%p1161_p3), %v1968_v14, %v1970_v15  ;;  %s1702_s11 = smov (!%p1161_p3), 2  }
 0x35c   : > { %v2103_v43 = vadd.s32 (!%p1161_p3), %v2097_v41, %v2093_v38  ;;  %1309 = vmatpush3.bf16.msra.mxu0 (!%p1161_p3), %v1164_v44  ;;  %1289 = vmatpush3.bf16.msra.mxu1 (!%p1161_p3), %v1164_v44  ;;  %v678_v10 = vsel (!%p1161_p3), %vm308_vm0, 1, %v1701_v9  ;;  %v1168_v12 = vcombine.low (!%p1161_p3), %v1972_v16, %v1974_v17  ;;  %v1169_v15 = vcombine.low (!%p1161_p3), %v1976_v18, %v1978_v19  ;;  %s1704_s6 = smov (!%p1161_p3), 126  }
 0x35d   : > { %1310 = vmatprep.subr.bf16.mxu0 (!%p1161_p3), %v1698_v42  ;;  %1290 = vmatprep.subr.bf16.mxu1 (!%p1161_p3), %v1698_v42  ;;  %v1170_v16 = vcombine.low (!%p1161_p3), %v1980_v20, %v1982_v21  ;;  %vm1703_vm11 = vmmov (!%p1161_p3), 0   ;;  %v1171_v17 = vcombine.low (!%p1161_p3), %v1984_v22, %v1986_v23  ;;  %v690_v18 = vsel (!%p1161_p3), %vm313_vm1, 1, %v1701_v9  ;;  %v1006_v9 = vld [vmem:[%s1947_s21 + $0x3] sm:$0x1] (!%p1161_p3) }
 0x35e   : > { %vm664_vm9 = vcmp.lt.s32.totalorder (!%p1161_p3), %v2103_v43, 9  ;;  %1324 = vmatprep.mubr.msk.bf16.mxu0 (!%p1161_p3), %vm1703_vm11, %v1698_v42  ;;  %1304 = vmatprep.mubr.msk.bf16.mxu1 (!%p1161_p3), %vm1703_vm11, %v1698_v42  ;;  %v665_v31 = vadd.s32 (!%p1161_p3), %v2097_v41, %v1937_v1  ;;  %vm860_vm0 = vcmask (!%p1161_p3), 1043456   ;;  %vm856_vm1 = vcmask (!%p1161_p3), 64512  }
 0x35f   : > { %v2111_v0 = vsel (!%p1161_p3), %vm664_vm9, %v1952_v6, 0.0  ;;  %v681_v6 = vsub.s32 (!%p1161_p3), 0, %v2093_v38  ;;  %v673_v2 = vsel (!%p1161_p3), %vm664_vm9, %v1954_v7, 0.0 }
 0x360   : > { %674 = vrot.lane.b32.xlu0 (!%p1161_p3), %v2111_v0, %s1699_s8  ;;  %1311 = vmatpush3.bf16.msra.mxu0 (!%p1161_p3), %v1165_v45  ;;  %vm666_vm14 = vcmp.lt.s32.totalorder (!%p1161_p3), %v665_v31, 9  ;;  %v854_v33 = vpack.c.bf16 (!%p1161_p3), %v673_v2, %v673_v2 }
 0x361   : > { %1312 = vmatprep.subr.bf16.mxu0 (!%p1161_p3), %v1698_v42  ;;  %1291 = vmatpush3.bf16.msra.mxu1 (!%p1161_p3), %v1165_v45  ;;  %v2131_v11 = vrot.slane (!%p1161_p3), %v678_v10, %v681_v6  ;;  %v694_v19 = vrot.slane (!%p1161_p3), %v690_v18, %v681_v6  ;;  %v1163_v1 = vsel (!%p1161_p3), %vm666_vm14, 1.0, %v1698_v42 }
 0x362   : > { %1292 = vmatprep.subr.bf16.mxu1 %v1698_v42  ;;  %v669_v7 = vpack.c.bf16 %v1163_v1, %v1163_v1  ;;  %v948_v40 = vsel %vm860_vm0, %v854_v33, 0 }
 0x363   : > { %vm683_vm10 = vcmp.eq.s32.totalorder %v2131_v11, 1  ;;  %vm695_vm12 = vcmp.eq.s32.totalorder %v694_v19, 1 }
 0x364   : > { %676 = vrot.lane.b32.xlu0 %v2111_v0, %s1700_s30  ;;  %1313 = vmatpush3.bf16.msra.mxu0 %v1166_v8 }
 0x365   : > { %1293 = vmatpush3.bf16.msra.mxu1 %v1166_v8  ;;  %1314 = vmatprep.subr.bf16.mxu0 %v1698_v42 }
 0x366   : > { %1294 = vmatprep.subr.bf16.mxu1 %v1698_v42 }
 0x368   : > { %1315 = vmatpush3.bf16.msra.mxu0 %v1167_v46 }
 0x369   : > { %1295 = vmatpush3.bf16.msra.mxu1 %v1167_v46  ;;  %1316 = vmatprep.subr.bf16.mxu0 %v1698_v42 }
 0x36a   : > { %1296 = vmatprep.subr.bf16.mxu1 %v1698_v42 }
 0x36c   : > { %1317 = vmatpush3.bf16.msra.mxu0 %v1168_v12 }
 0x36d   : > { %1297 = vmatpush3.bf16.msra.mxu1 %v1168_v12  ;;  %1318 = vmatprep.subr.bf16.mxu0 %v1698_v42 }
 0x36e   : > { %1298 = vmatprep.subr.bf16.mxu1 %v1698_v42 }
 0x370   : > { %1319 = vmatpush3.bf16.msra.mxu0 %v1169_v15 }
 0x371   : > { %1320 = vmatprep.subr.bf16.mxu0 %v1698_v42  ;;  %1299 = vmatpush3.bf16.msra.mxu1 %v1169_v15 }
 0x372   : > { %1300 = vmatprep.subr.bf16.mxu1 %v1698_v42 }
 0x374   : > { %1321 = vmatpush3.bf16.msra.mxu0 %v1170_v16 }
 0x375   : > { %1322 = vmatprep.subr.bf16.mxu0 %v1698_v42  ;;  %1301 = vmatpush3.bf16.msra.mxu1 %v1170_v16 }
 0x376   : > { %1302 = vmatprep.subr.bf16.mxu1 %v1698_v42 }
 0x378   : > { %1323 = vmatpush3.bf16.msra.mxu0 %v1171_v17 }
 0x379   : > { %1303 = vmatpush3.bf16.msra.mxu1 %v1171_v17  ;;  %1328 = vmatprep.subr.bf16.mxu0 %v1698_v42 }
 0x37a   : > { %1334 = vmatprep.subr.bf16.mxu1 %v1698_v42 }
 0x3d2   : > { %v675_v47 = vpop.permute.xlu0 %674 }
 0x3d6   : > { %v677_v13 = vpop.permute.xlu0 %676 }
 0x3d7   : > { %v684_v25 = vsel %vm683_vm10, %v675_v47, %v677_v13  ;;  %v997_v47 = vld [vmem:[%s1947_s21] sm:$0x1] }
 0x3d8   : > { %v685_v14 = vmax.f32 %v2111_v0, %v684_v25 }
 0x3da   : > { %686 = vrot.lane.b32.xlu1 %v685_v14, %s1702_s11 }
 0x3de   : > { %688 = vrot.lane.b32.xlu1 %v685_v14, %s1704_s6 }
 0x44c   : > { %v687_v20 = vpop.permute.xlu1 %686 }
 0x450   : > { %v689_v21 = vpop.permute.xlu1 %688 }
 0x451   : > { %v696_v22 = vsel %vm695_vm12, %v687_v20, %v689_v21  ;;  %v1003_v20 = vld [vmem:[%s1947_s21 + $0x2] sm:$0x1] }
 0x452   : > { %v697_v23 = vmax.f32 %v685_v14, %v696_v22 }
 0x454   : > { %v698_v27 = vsub.f32 %v2111_v0, %v697_v23  ;;  %vm836_vm13 = vcmp.eq.f32.partialorder %v2111_v0, %v697_v23 }
 0x455   : > { %v837_v48 = vsel %vm836_vm13, %v1950_v5, 4.0 }
 0x456   : > { %v699_v49 = vmul.f32 1.442695, %v698_v27  ;;  %840 = vrot.lane.b32.xlu1 %v837_v48, %s1700_s30  ;;  %838 = vrot.lane.b32.xlu0 %v837_v48, %s1699_s8 }
 0x458   : > { %1474 = vpow2.f32 %v699_v49 }
 0x462   : > { %v1475_v28 = vpop.eup %1474 }
 0x463   : > { %v701_v29 = vpack.c.bf16 %v1475_v28, %v1475_v28 }
 0x465   : > { %v702_v50 = vunpack.c.l.bf16 %v701_v29  ;;  %1325 = vmatmul.mubr.bf16.vlgmr.msra.gmra.mrb[0].mxu0 %v701_v29 }
 0x466   : > { %1330 = vmatprep.mubr.msk.bf16.mxu0 %vm1703_vm11, %v1698_v42 }
 0x467   : > { %v703_v51 = vsub.f32 %v1475_v28, %v702_v50 }
 0x469   : > { %v704_v52 = vpack.c.bf16 %v703_v51, %v703_v51 }
 0x46b   : > { %1305 = vmatmul.mubr.bf16.vlgmr.msra.gmra.mrb[0].mxu1 %v704_v52 }
 0x46c   : > { %1336 = vmatprep.mubr.msk.bf16.mxu1 %vm1703_vm11, %v1698_v42 }
 0x4c8   : > { %v841_v53 = vpop.permute.xlu1 %840  ;;  %v839_v55 = vpop.permute.xlu0 %838 }
 0x4c9   : > { %v842_v56 = vsel %vm683_vm10, %v839_v55, %v841_v53 }
 0x4ca   : > { %v843_v57 = vmin.f32 %v837_v48, %v842_v56 }
 0x4cc   : > { %846 = vrot.lane.b32.xlu1 %v843_v57, %s1704_s6  ;;  %844 = vrot.lane.b32.xlu0 %v843_v57, %s1702_s11 }
 0x538   : > { %v827_v58 = vpop.f32.mrb[0].mxu0 }
 0x539   : > { %v1326_v59 = vpop.f32.mrb[1].mxu0 }
 0x53a   : > { %v830_v60 = vpop.f32.mrb[2].mxu0 }
 0x53b   : > { %v1327_v61 = vpop.f32.mrb[3].mxu0 }
 0x53e   : > { %v847_v62 = vpop.permute.xlu1 %846  ;;  %v845_v63 = vpop.permute.xlu0 %844 }
 0x53f   : > { %v848_v54 = vsel %vm695_vm12, %v845_v63, %v847_v62  ;;  %v787_v3 = vpop.f32.mrb[0].mxu1 }
 0x540   : > { %v849_v4 = vmin.f32 %v843_v57, %v848_v54  ;;  %v828_v24 = vadd.f32 %v827_v58, %v787_v3  ;;  %v1306_v26 = vpop.f32.mrb[1].mxu1 }
 0x541   : > { %v790_v30 = vpop.f32.mrb[2].mxu1 }
 0x542   : > { %vm850_vm15 = vcmp.eq.f32.partialorder %v1950_v5, %v849_v4  ;;  %1476 = vlog2.f32 %v828_v24  ;;  %v1307_v32 = vpop.f32.mrb[3].mxu1 }
 0x543   : > { %v1172_v34 = vsel %vm850_vm15, 1.0, %v1698_v42 }
 0x544   : > { %v853_v35 = vpack.c.bf16 %v1172_v34, %v1172_v34 }
 0x546   : > { %v905_v36 = vsel %vm860_vm0, %v853_v35, 0  ;;  %v855_v37 = vmul.bf16 %v854_v33, %v853_v35 }
 0x547   : > { %1335 = vmatpush3.bf16.msra.mxu1 %v905_v36 }
 0x548   : > { %v862_v39 = vsel %vm860_vm0, %v855_v37, 0  ;;  %1340 = vmatprep.subr.bf16.mxu1 %v1698_v42 }
 0x549   : > { %1329 = vmatpush3.bf16.msra.mxu0 %v862_v39 }
 0x54a   : > { %1337 = vmatmul.mubr.msk.bf16.vlgmr.msra.gmra.mrb[4].mxu1 %vm856_vm1, %v669_v7 }
 0x54b   : > { %1341 = vmatpush3.bf16.msra.mxu1 %v948_v40  ;;  %1342 = vmatprep.mubr.msk.bf16.mxu1 %vm1703_vm11, %v1698_v42  ;;  %v1000_v42 = vld [vmem:[%s1947_s21 + $0x1] sm:$0x1] }
 0x54c   : > { %v1477_v5 = vpop.eup %1476  ;;  %1331 = vmatmul.mubr.msk.bf16.vlgmr.msra.gmra.mrb[4].mxu0 %vm856_vm1, %v669_v7 }
 0x54d   : > { %v834_v38 = vmul.f32 0.6931472, %v1477_v5 }
 0x54f   : > { %v835_v41 = vsub.f32 %v698_v27, %v834_v38 }
 0x551   : > { %v990_v43 = vmul.f32 %v835_v41, %v673_v2 }
 0x552   : > { %1343 = vmatmul.mubr.msk.bf16.vlgmr.msra.gmra.mrb[8].mxu1 %vm856_vm1, %v669_v7 }
 0x553   : > { %v991_v44 = vrot.slane %v990_v43, 4 }
 0x555   : > { %v992_v0 = vadd.f32 %v991_v44, %v990_v43 }
 0x557   : > { %v993_v45 = vrot.slane %v992_v0, 2 }
 0x559   : > { %v994_v6 = vadd.f32 %v993_v45, %v992_v0 }
 0x55b   : > { %v995_v8 = vrot.slane %v994_v6, 1 }
 0x55d   : > { %v996_v10 = vadd.f32 %v995_v8, %v994_v6 }
 0x55f   : > { %v1007_v11 = vadd.f32 %v1006_v9, %v996_v10 }
 0x561   : > { %1008 = vst [vmem:[%s1947_s21 + $0x3] sm:$0x1] %v1007_v11 }
 0x61d   : > { %v941_v46 = vpop.f32.mrb[4].mxu1 }
 0x61e   : > { %v1001_v12 = vadd.f32 %v1000_v42, %v941_v46  ;;  %v1338_v13 = vpop.f32.mrb[5].mxu1 }
 0x61f   : > { %v944_v25 = vpop.f32.mrb[6].mxu1  ;;  %v898_v14 = vpop.f32.mrb[4].mxu0 }
 0x620   : > { %1002 = vst [vmem:[%s1947_s21 + $0x1] sm:$0x1] %v1001_v12  ;;  %v1339_v15 = vpop.f32.mrb[7].mxu1  ;;  %v998_v16 = vadd.f32 %v997_v47, %v898_v14  ;;  %v1332_v17 = vpop.f32.mrb[5].mxu0 }
 0x621   : > { %v901_v18 = vpop.f32.mrb[6].mxu0 }
 0x622   : > { %999 = vst [vmem:[%s1947_s21] sm:$0x1] %v998_v16  ;;  %v1333_v19 = vpop.f32.mrb[7].mxu0 }
 0x625   : > { %v984_v21 = vpop.f32.mrb[8].mxu1 }
 0x626   : > { %v1004_v22 = vadd.f32 %v1003_v20, %v984_v21  ;;  %v1344_v23 = vpop.f32.mrb[9].mxu1 }
 0x627   : > { %v987_v27 = vpop.f32.mrb[10].mxu1 }
 0x628   : > { %1005 = vst [vmem:[%s1947_s21 + $0x2] sm:$0x1] %v1004_v22  ;;  %v1345_v48 = vpop.f32.mrb[11].mxu1 }
 0x629 PF: > { %s1177_s29 = sshll.u32 %s1672_s18, 7  ;;  %s1023_s2 = sshll.u32 %s1947_s21, 4  ;;  %s1024_s2 = int_to_ptr.vmem [resolvable:$true] %s1023_s2 }
 0x62a   : > { %s2204_s22 = scalar_lea.hbm %s2261_s3, %s1177_s29  ;;  %s1010_s5 = scalar_lea.sflag [#allocation4], %s264_s26 }
 0x62b   : > { %s1566_s23 = scalar_lea.vmem %s1024_s2, 128  ;;  %p2286_p9 = scmp.ne.s32.totalorder %s2273_s24, 0 }
 0x62c   : > { %p1567_p7 = scmp.ne.s32.totalorder %s1024_s2, %s1566_s23  ;;  %s1705_s27 = smov [#allocation8]  }
 0x62d   : > { %s1570_s4 = sshll.u32 %s1705_s27, 4  ;;  %s1571_s4 = int_to_ptr.vmem [resolvable:$false] %s1570_s4 }
 0x62e   : > { %p1568_p1 = pnand %p1567_p7, %p2286_p9  ;;  %s1572_s17 = scalar_lea.vmem %s1571_s4, 256 }
 0x62f   : > { %p1573_p12 = scmp.lt.s32.totalorder %s1024_s2, %s1571_s4  ;;  %p1574_p6 = scmp.lt.s32.totalorder %s1572_s17, %s1566_s23 }
 0x630   : > { %p1569_p4 = pneg %p1568_p1 }
 0x631   : > { %p1575_p11 = por %p1574_p6, %p1573_p12 }
 0x633   : > { %p1576_p13 = pnand %p1575_p11, %p1569_p4 }
 0x635   : > { %1579 = shalt.err (!%p1576_p13)
}
 0x636   : > { %s1580_s18 = scalar_lea.hbm %s2204_s22, 128  ;;  %s1584_s19 = scalar_lea.hbm %s2261_s3, 256 }
 0x637   : > { %p1581_p10 = scmp.ne.s32.totalorder %s2204_s22, %s1580_s18  ;;  %p1585_p0 = scmp.lt.u32.totalorder %s2204_s22, %s2261_s3 }
 0x638   : > { %p1586_p2 = scmp.lt.u32.totalorder %s1584_s19, %s1580_s18  ;;  %p1588_p7 = scmp.lt.u32.totalorder %s1580_s18, %s2204_s22 }
 0x639   : > { %p1582_p8 = pnand %p1581_p10, %p2286_p9 }
 0x63a   : > { %p1587_p3 = por %p1586_p2, %p1585_p0 }
 0x63b   : > { %p1583_p5 = pneg %p1582_p8 }
 0x63c   : > { %p1589_p1 = por %p1588_p7, %p1587_p3 }
 0x63e   : > { %p1590_p4 = pnand %p1589_p1, %p1583_p5 }
 0x640   : > { %1593 = shalt.err (!%p1590_p4)
}
 0x641   : > { %1356 = dma.vmem_to_hbm [thread:$0]  (%p2286_p9), %s1024_s2, 128, %s2204_s22, %s1010_s5  }
 0x642 PF: > { %s1035_s8 = sand.u32 1, %s1648_s12   ;;  %p2287_p12 = scmp.ne.s32.totalorder %s2274_s25, 0 }
 0x643   : > { %p2288_p6 = scmp.ge.s32.totalorder %s1680_s20, 2  ;;  %s1036_s30 = scalar_lea.sflag [#allocation4], %s1035_s8 }
 0x645   : > { %p1370_p11 = pnand %p2288_p6, %p2287_p12 }
 0x647   : > { %1643 = dma.done.wait (!%p1370_p11), %s1036_s30, 128  }
 0x648   : > { %1645 = vsyncadd (!%p1370_p11), %s1036_s30, 4294967168  ;;  %s22_s20 = sadd.s32 1, %s1680_s20   ;;  %s2289_s24 = sld [smem:[#allocation13_spill]] }
 0x649   : > { %p19_p13 = scmp.ge.s32.totalorder %s22_s20, 4   ;;  %s2290_s17 = sld [smem:[#allocation16_spill]] }
 0x64a   : > { %s2291_s18 = sld [smem:[#allocation14_spill]]  ;;  %s2292_s19 = sld [smem:[#allocation15_spill]] }
 0x64b   : > { %s2293_s12 = smov %s1652_s13  ;;  %s2294_s13 = smov %s1656_s14 }
 0x64c   : > { %s2295_s14 = smov %s1846_s10  ;;  %s2296_s15 = smov %s1664_s16 }
 0x64d   :  { %21 = sbr.rel (!%p19_p13) target bundleno = 12 (0xc), region = 106 }
 0x64e   : > { %s2297_s16 = smov %s2289_s24 }
 0x654   :  { %1041 = vsyncpa [#allocation3], 1 }
 0x655   :  { %1043 = vsyncpa [#allocation3 + $0x1], 1 }
 0x656   :  { %1044 = vsyncpa [#allocation6], 1 }
 0x657   :  { %1046 = vsyncpa [#allocation6 + $0x1], 1 }
 0x658   :  { %1047 = vsyncpa [#allocation4], 1 }
 0x659   :  { %1049 = vsyncpa [#allocation4 + $0x1], 1 }

</bundles_post_ra>
